<compile_context>
chip_gen: v5e
topology: v5e:2x2
jax: 0.10.0
libtpu: 0.0.40
codegen_flags: <defaults>
</compile_context>

<pallas_src>
import functools
import math

import jax
import jax.numpy as jnp
from jax.experimental import pallas as pl
from jax.experimental.pallas import tpu as pltpu

THRESHOLD = 0.5
INIT_RANGE = 0.5

_LANES = 128
_SUBLANES = 8
_MAX_TB = 256


def _round_up(v, m):
    return ((v + m - 1) // m) * m


# ---------------------------------------------------------------------------
# Kernel
# ---------------------------------------------------------------------------
def _mllp_top_kernel(metas, xc_ref, xb_ref, *refs):
    """Fused MLLP_top forward for one batch tile.

    metas: per-layer static tuples
        (n, p_cur, p_res, p_out, n_blk, src_cur, src_res, dst)
      src_* / dst are either "x" (the padded input refs), an int scratch slot,
      or "out" (the output refs).
    refs = 4 weight refs per layer (wc, wd, wbin_fused, colsum),
           then oc_ref, ob_ref outputs, then 2 VMEM activation scratches
           (3 round-robin slots each, so reads never alias the write slot).
    """
    num_layers = len(metas)
    w_refs = refs[:4 * num_layers]
    oc_ref = refs[4 * num_layers]
    ob_ref = refs[4 * num_layers + 1]
    act_c = refs[4 * num_layers + 2]      # (3, TB, p_act_max) f32
    act_b = refs[4 * num_layers + 3]      # (3, TB, p_act_max) f32 (0/1 values)

    tb = xc_ref.shape[0]
    z128 = jnp.zeros((tb, _LANES), jnp.float32)   # shared pad-zero source

    def read_c(tag, c0, c1):
        return xc_ref[:, c0:c1] if tag == "x" else act_c[tag, :, c0:c1]

    def read_b(tag, c0, c1):
        return xb_ref[:, c0:c1] if tag == "x" else act_b[tag, :, c0:c1]

    def store_c(tag, c0, c1, val):
        if tag == "out":
            oc_ref[:, c0:c1] = val
        else:
            act_c[tag, :, c0:c1] = val

    def store_b(tag, c0, c1, val):
        if tag == "out":
            ob_ref[:, c0:c1] = val
        else:
            act_b[tag, :, c0:c1] = val

    def newton_recip(x):
        # x >= 1 here; EUP approx reciprocal + one Newton step ~= exact f32.
        r = pl.reciprocal(x, approx=True)
        return r * (2.0 - x * r)

    for li, meta in enumerate(metas):
        (n, p_cur, p_res, p_out, n_blk, src_cur, src_res, dst) = meta
        wc_ref, wd_ref, wbin_ref, colsum_ref = w_refs[4 * li:4 * li + 4]

        # Segments of the (virtual) skip-concat input: [current | residual].
        segs = [(src_cur, 0, p_cur)]
        if src_res is not None:
            segs.append((src_res, p_cur, p_res))

        # ---- binarized path: one fused bf16 MXU matmul per segment --------
        cnt = None
        for (tag, col0, width) in segs:
            lhs = read_b(tag, 0, width).astype(jnp.bfloat16)   # exact 0/1
            part = jnp.dot(lhs, wbin_ref[col0:col0 + width, :],
                           preferred_element_type=jnp.float32)  # (TB, 2n)
            cnt = part if cnt is None else cnt + part
        # conj "zeroing" hits = colsum - (#ones of x meeting a 1-weight);
        # all quantities are exact small integers in f32.
        conj_b = (colsum_ref[:, 0:n] - cnt[:, 0:n] < 0.5).astype(jnp.float32)
        disj_b = (cnt[:, n:2 * n] > 0.5).astype(jnp.float32)
        store_b(dst, 0, n, conj_b)
        store_b(dst, n, 2 * n, disj_b)

        # ---- continuous path: running-product accumulator -----------------
        # One log per accumulator lane per (rule, row) instead of one per
        # feature: sum_d log f_d == sum_lanes log prod_chunks f.
        for r0 in range(0, n, n_blk):
            rows = min(n_blk, n - r0)
            acc_c = jnp.ones((tb, rows, _LANES), jnp.float32)
            acc_d = jnp.ones((tb, rows, _LANES), jnp.float32)
            for (tag, col0, width) in segs:
                for s in range(0, width, _LANES):
                    x = read_c(tag, s, s + _LANES)                    # (TB,128)
                    wcc = wc_ref[r0:r0 + rows, col0 + s:col0 + s + _LANES]
                    wdc = wd_ref[r0:r0 + rows, col0 + s:col0 + s + _LANES]
                    acc_c = acc_c * (1.0 - (1.0 - x)[:, None, :] * wcc[None, :, :])
                    acc_d = acc_d * (1.0 - x[:, None, :] * wdc[None, :, :])
            # Guard f32 underflow (true output would be ~0 there anyway).
            acc_c = jnp.maximum(acc_c, 1e-37)
            acc_d = jnp.maximum(acc_d, 1e-37)
            s_conj = jnp.sum(jnp.log(acc_c), axis=-1)                 # (TB,rows)
            s_disj = jnp.sum(jnp.log(acc_d), axis=-1)
            # -1/(-1 + s) == 1/(1 - s), with s <= 0 so 1 - s >= 1.
            store_c(dst, r0, r0 + rows, newton_recip(1.0 - s_conj))
            store_c(dst, n + r0, n + r0 + rows, 1.0 - newton_recip(1.0 - s_disj))

        # Zero the lane-pad tail of this layer's activation once, so all
        # downstream chunk reads (zero weights there) and the final HBM block
        # stay finite.  Uses the shared zeros vreg (no per-layer broadcasts).
        pad = p_out - 2 * n
        if pad > 0:
            store_c(dst, 2 * n, p_out, z128[:, 0:pad])
            store_b(dst, 2 * n, p_out, z128[:, 0:pad])


# ---------------------------------------------------------------------------
# Wrapper: tiling / padding / weight prep / pallas_call
# ---------------------------------------------------------------------------
def _pick_vmem_limit_bytes():
    try:
        kind = jax.devices()[0].device_kind.lower()
    except Exception:
        kind = ""
    if ("v5" in kind) or ("v6" in kind):
        return 96 * 1024 * 1024          # 128 MiB physical VMEM on v5e/v6e
    if ("v7" in kind) or ("7x" in kind):
        return 48 * 1024 * 1024          # 64 MiB physical per TC on v7x
    return 32 * 1024 * 1024              # conservative default


def _estimate_vmem_bytes(tb, n_blk, geoms, p0, p_out_last, p_act_max):
    w = 0
    for (n, p_cat) in geoms:
        w += 2 * n * p_cat * 4            # wc, wd (f32)
        w += p_cat * (2 * n) * 2          # fused binarized weight (bf16)
        w += _round_up(n, _LANES) * 4     # colsum
    w *= 2                                # pipeliner double-buffers inputs
    act = 2 * 3 * tb * p_act_max * 4      # two (3, TB, p_act_max) f32 scratches
    io = 2 * 2 * tb * p0 * 4 + 2 * 2 * tb * p_out_last * 4
    max2n = max(2 * n for n, _ in geoms)
    tmp = tb * n_blk * _LANES * 4 * 3     # two accs + chunk temp
    tmp += 2 * tb * max2n * 4             # fused-dot result etc.
    return w + act + io + tmp


def _choose_tiling(B, geoms, p0, p_out_last, p_act_max, vmem_limit):
    """Co-size the batch tile and the rule-block so the live set fits VMEM."""
    max_n8 = _round_up(max(n for n, _ in geoms), _SUBLANES)
    budget = int(vmem_limit * 0.7)
    temp_budget = min(4 << 20, max(budget // 4, 1 << 20))
    tb_max, n_blk_cap = _SUBLANES, _SUBLANES
    for tb_c in (_MAX_TB, 192, 128, 96, 64, 48, 32, 16, _SUBLANES):
        nb = (temp_budget // (tb_c * _LANES * 4 * 3)) // _SUBLANES * _SUBLANES
        nb = max(_SUBLANES, min(max_n8, nb))
        if _estimate_vmem_bytes(tb_c, nb, geoms, p0, p_out_last, p_act_max) <= budget:
            tb_max, n_blk_cap = tb_c, nb
            break
    n_tiles = max(1, math.ceil(B / tb_max))
    if n_tiles == 1 and B >= 2 * _SUBLANES:
        n_tiles = 2                        # v7x: give both TensorCores a tile
    tb = min(tb_max, _round_up(math.ceil(B / n_tiles), _SUBLANES))
    return tb, n_tiles, n_blk_cap


def mllp_top_forward(continuous_output, binarized_output, layer_params):
    """Mirrors MLLP_top.forward with one fused Pallas kernel call."""
    B, D0 = continuous_output.shape
    num_layers = len(layer_params)
    assert num_layers >= 1
    dims = tuple(int(wc.shape[0]) for wc, _ in layer_params)

    # ---- static geometry: padded widths of every layer's input segments ----
    p0 = _round_up(D0, _LANES)
    geoms = []                             # (n, p_cat) per layer
    p_cur, p_res = p0, None
    for n in dims:
        p_cat = p_cur + (p_res if p_res is not None else 0)
        geoms.append((n, p_cat))
        p_res, p_cur = p_cur, _round_up(2 * n, _LANES)
    p_out_last = p_cur
    out_true = 2 * dims[-1]
    if num_layers >= 2:
        p_act_max = max(_round_up(2 * n, _LANES) for n in dims[:-1])
    else:
        p_act_max = _LANES                 # scratch unused for a single layer

    vmem_limit = _pick_vmem_limit_bytes()
    tb, n_tiles, n_blk_cap = _choose_tiling(B, geoms, p0, p_out_last,
                                            p_act_max, vmem_limit)
    b_pad = n_tiles * tb

    # ---- pad inputs: batch rows to b_pad, feature lanes to a 128 multiple --
    # Padded entries only ever meet zero weight columns, so any finite
    # in-range value works (0.5 keeps log args away from 0).
    xc = jnp.pad(continuous_output.astype(jnp.float32),
                 ((0, b_pad - B), (0, p0 - D0)), constant_values=0.5)
    xb = jnp.pad(binarized_output.astype(jnp.float32),
                 ((0, b_pad - B), (0, p0 - D0)), constant_values=0.0)

    # ---- per-layer weights (padded / binarized / fused / colsum) + metas ---
    w_inputs, w_specs, metas = [], [], []
    cur_true, p_cur = D0, p0
    res_true, p_res = None, None
    for i, (wc, wd) in enumerate(layer_params):
        n = int(wc.shape[0])
        expected = cur_true + (res_true if res_true is not None else 0)
        assert wc.shape == (n, expected) and wd.shape == (n, expected)
        p_cat = p_cur + (p_res if res_true is not None else 0)

        def _scatter(w):
            wp = jnp.zeros((n, p_cat), jnp.float32)
            wp = wp.at[:, 0:cur_true].set(w[:, 0:cur_true].astype(jnp.float32))
            if res_true is not None:
                wp = wp.at[:, p_cur:p_cur + res_true].set(
                    w[:, cur_true:cur_true + res_true].astype(jnp.float32))
            return wp

        wcp, wdp = _scatter(wc), _scatter(wd)
        wcb = (wcp > THRESHOLD).astype(jnp.float32)
        wdb = (wdp > THRESHOLD).astype(jnp.float32)
        wbin = jnp.concatenate([wcb.T, wdb.T], axis=1).astype(jnp.bfloat16)
        n_lpad = _round_up(n, _LANES)
        colsum = jnp.zeros((1, n_lpad), jnp.float32)
        colsum = colsum.at[0, 0:n].set(jnp.sum(wcb, axis=1))

        w_inputs += [wcp, wdp, wbin, colsum]
        w_specs += [
            pl.BlockSpec((n, p_cat), lambda g: (0, 0)),
            pl.BlockSpec((n, p_cat), lambda g: (0, 0)),
            pl.BlockSpec((p_cat, 2 * n), lambda g: (0, 0)),
            pl.BlockSpec((1, n_lpad), lambda g: (0, 0)),
        ]

        # 3 round-robin scratch slots: the write slot never aliases a source.
        src_cur = "x" if i == 0 else (i - 1) % 3
        src_res = None if i == 0 else ("x" if i == 1 else (i - 2) % 3)
        dst = "out" if i == num_layers - 1 else i % 3
        p_out = _round_up(2 * n, _LANES)
        n_blk = min(n, n_blk_cap)
        metas.append((n, p_cur, p_res, p_out, n_blk, src_cur, src_res, dst))

        res_true, p_res = cur_true, p_cur
        cur_true, p_cur = 2 * n, p_out

    kernel = functools.partial(_mllp_top_kernel, tuple(metas))
    oc, ob = pl.pallas_call(
        kernel,
        out_shape=(
            jax.ShapeDtypeStruct((b_pad, p_out_last), jnp.float32),
            jax.ShapeDtypeStruct((b_pad, p_out_last), jnp.float32),
        ),
        grid=(n_tiles,),
        in_specs=[
            pl.BlockSpec((tb, p0), lambda g: (g, 0)),
            pl.BlockSpec((tb, p0), lambda g: (g, 0)),
        ] + w_specs,
        out_specs=(
            pl.BlockSpec((tb, p_out_last), lambda g: (g, 0)),
            pl.BlockSpec((tb, p_out_last), lambda g: (g, 0)),
        ),
        scratch_shapes=[
            pltpu.VMEM((3, tb, p_act_max), jnp.float32),
            pltpu.VMEM((3, tb, p_act_max), jnp.float32),
        ],
        compiler_params=pltpu.CompilerParams(
            dimension_semantics=("parallel",),
            vmem_limit_bytes=vmem_limit,
        ),
    )(xc, xb, *w_inputs)
    return oc[:B, :out_true], ob[:B, :out_true]


# ---------------------------------------------------------------------------
# Parameter init + pure-JAX reference (for the self-test)
# ---------------------------------------------------------------------------
def init_mllp_top_params(key, dim_list, bottom_structure_list):
    """Deterministic W = INIT_RANGE * U(0,1), matching MLLP_top.__init__ shapes."""
    prev = 0
    for bs in bottom_structure_list:
        prev += list(map(int, bs.split('@')))[-1]
    prev *= 2
    layer_dim_list = [prev]
    params = []
    for i, n in enumerate(dim_list):
        num = prev
        if i >= 1:
            num += layer_dim_list[-2]
        key, kc, kd = jax.random.split(key, 3)
        wc = INIT_RANGE * jax.random.uniform(kc, (n, num), dtype=jnp.float32)
        wd = INIT_RANGE * jax.random.uniform(kd, (n, num), dtype=jnp.float32)
        params.append((wc, wd))
        prev = 2 * n
        layer_dim_list.append(prev)
    return params


def _ref_forward(cont, binz, layer_params):
    """Pure-JAX (XLA) reference mirroring MLLP_top.forward."""
    def union_cont(x, wc, wd):
        sc = jnp.sum(jnp.log(1.0 - (1.0 - x)[:, None, :] * wc[None, :, :]), -1)
        sd = jnp.sum(jnp.log(1.0 - x[:, None, :] * wd[None, :, :]), -1)
        return jnp.concatenate(
            [-1.0 / (-1.0 + sc), 1.0 - (-1.0 / (-1.0 + sd))], axis=1)

    def union_bin(x, wc, wd):
        wcb = (wc > THRESHOLD).astype(jnp.float32)
        wdb = (wd > THRESHOLD).astype(jnp.float32)
        pc = jnp.prod(1.0 - (1.0 - x)[:, None, :] * wcb[None, :, :], axis=-1)
        pd = jnp.prod(1.0 - x[:, None, :] * wdb[None, :, :], axis=-1)
        return jnp.concatenate([pc, 1.0 - pd], axis=1)

    xc, xb = cont, binz
    res_c = res_b = None
    for wc, wd in layer_params:
        cat_c = xc if res_c is None else jnp.concatenate([xc, res_c], axis=1)
        cat_b = xb if res_b is None else jnp.concatenate([xb, res_b], axis=1)
        res_c, res_b = xc, xb
        xc, xb = union_cont(cat_c, wc, wd), union_bin(cat_b, wc, wd)
    return xc, xb


if __name__ == "__main__":
    key = jax.random.PRNGKey(0)
    kp, kx, kb = jax.random.split(key, 3)

    dim_list = [8, 4]                    # two top UnionLayers
    bottom_structure_list = ['1@16']     # bottom last dim 16 -> top input dim 32
    params = init_mllp_top_params(kp, dim_list, bottom_structure_list)

    B, D0 = 2, 32
    continuous_output = jax.random.uniform(kx, (B, D0), dtype=jnp.float32)
    binarized_output = (jax.random.uniform(kb, (B, D0)) > 0.5).astype(jnp.float32)

    cont, binz = mllp_top_forward(continuous_output, binarized_output, params)
    jax.block_until_ready((cont, binz))

    assert cont.shape == (B, 2 * dim_list[-1])
    assert binz.shape == (B, 2 * dim_list[-1])
    assert bool(jnp.all(jnp.isfinite(cont)))

    ref_c, ref_b = _ref_forward(continuous_output, binarized_output, params)
    # Newton-refined reciprocal + product-vs-sum-of-logs rounding only:
    # continuous path is now tight; binarized path is exact by construction.
    assert bool(jnp.allclose(cont, ref_c, atol=2e-3, rtol=2e-3)), "continuous mismatch"
    assert bool(jnp.allclose(binz, ref_b, atol=1e-6)), "binarized mismatch"
    print("KERNEL_OK")
</pallas_src>

<mosaic_0001>
module attributes {stable_mosaic.version = 11 : i64} {
  func.func @_mllp_top_kernel(%arg0: i32, %arg1: memref<8x128xf32, #tpu.memory_space<vmem>>, %arg2: memref<8x128xf32, #tpu.memory_space<vmem>>, %arg3: memref<8x128xf32, #tpu.memory_space<vmem>>, %arg4: memref<8x128xf32, #tpu.memory_space<vmem>>, %arg5: memref<128x16xbf16, #tpu.memory_space<vmem>>, %arg6: memref<1x128xf32, #tpu.memory_space<vmem>>, %arg7: memref<4x256xf32, #tpu.memory_space<vmem>>, %arg8: memref<4x256xf32, #tpu.memory_space<vmem>>, %arg9: memref<256x8xbf16, #tpu.memory_space<vmem>>, %arg10: memref<1x128xf32, #tpu.memory_space<vmem>>, %arg11: memref<8x128xf32, #tpu.memory_space<vmem>>, %arg12: memref<8x128xf32, #tpu.memory_space<vmem>>, %arg13: memref<3x8x128xf32, #tpu.memory_space<vmem>>, %arg14: memref<3x8x128xf32, #tpu.memory_space<vmem>>) attributes {dimension_semantics = [#tpu.dimension_semantics<parallel>], iteration_bounds = array<i64: 1>, scalar_prefetch = 0 : i64, scratch_operands = 2 : i64, tpu.core_type = #tpu.core_type<tc>, window_params = [{transform_indices = @transform_0, window_bounds = array<i64: 8, 128>}, {transform_indices = @transform_1, window_bounds = array<i64: 8, 128>}, {pipeline_mode = #tpu.pipeline_mode<synchronous>, transform_indices = @transform_2, window_bounds = array<i64: 8, 128>}, {pipeline_mode = #tpu.pipeline_mode<synchronous>, transform_indices = @transform_3, window_bounds = array<i64: 8, 128>}, {pipeline_mode = #tpu.pipeline_mode<synchronous>, transform_indices = @transform_4, window_bounds = array<i64: 128, 16>}, {pipeline_mode = #tpu.pipeline_mode<synchronous>, transform_indices = @transform_5, window_bounds = array<i64: 1, 128>}, {pipeline_mode = #tpu.pipeline_mode<synchronous>, transform_indices = @transform_6, window_bounds = array<i64: 4, 256>}, {pipeline_mode = #tpu.pipeline_mode<synchronous>, transform_indices = @transform_7, window_bounds = array<i64: 4, 256>}, {pipeline_mode = #tpu.pipeline_mode<synchronous>, transform_indices = @transform_8, window_bounds = array<i64: 256, 8>}, {pipeline_mode = #tpu.pipeline_mode<synchronous>, transform_indices = @transform_9, window_bounds = array<i64: 1, 128>}, {transform_indices = @transform_10, window_bounds = array<i64: 8, 128>}, {transform_indices = @transform_11, window_bounds = array<i64: 8, 128>}]} {
    %cst = arith.constant 0.000000e+00 : f32
    %0 = vector.broadcast %cst : f32 to vector<8x128xf32>
    %c0 = arith.constant 0 : index
    %c0_0 = arith.constant 0 : index
    %1 = vector.load %arg2[%c0, %c0_0] : memref<8x128xf32, #tpu.memory_space<vmem>>, vector<8x128xf32>
    %2 = arith.truncf %1 : vector<8x128xf32> to vector<8x128xbf16>
    %c0_1 = arith.constant 0 : index
    %c0_2 = arith.constant 0 : index
    %3 = vector.load %arg5[%c0_1, %c0_2] : memref<128x16xbf16, #tpu.memory_space<vmem>>, vector<128x16xbf16>
    %cst_3 = arith.constant dense<0.000000e+00> : vector<8x16xf32>
    %4 = tpu.matmul %2, %3, %cst_3 {dimension_numbers = #tpu.dot_dimension_numbers<[1], [0], [0], [1], [0, 0, 1, 1], [], []>} : vector<8x128xbf16>, vector<128x16xbf16>, vector<8x16xf32> -> vector<8x16xf32>
    %c0_4 = arith.constant 0 : index
    %c0_5 = arith.constant 0 : index
    %5 = vector.load %arg6[%c0_4, %c0_5] : memref<1x128xf32, #tpu.memory_space<vmem>>, vector<1x8xf32>
    %6 = vector.extract_strided_slice %4 {offsets = [0, 0], sizes = [8, 8], strides = [1, 1]} : vector<8x16xf32> to vector<8x8xf32>
    %7 = vector.broadcast %5 : vector<1x8xf32> to vector<8x8xf32>
    %8 = arith.subf %7, %6 : vector<8x8xf32>
    %cst_6 = arith.constant 5.000000e-01 : f32
    %9 = vector.broadcast %cst_6 : f32 to vector<8x8xf32>
    %10 = arith.cmpf olt, %8, %9 : vector<8x8xf32>
    %11 = arith.extui %10 : vector<8x8xi1> to vector<8x8xi32>
    %12 = arith.sitofp %11 : vector<8x8xi32> to vector<8x8xf32>
    %13 = vector.extract_strided_slice %4 {offsets = [0, 8], sizes = [8, 8], strides = [1, 1]} : vector<8x16xf32> to vector<8x8xf32>
    %cst_7 = arith.constant 5.000000e-01 : f32
    %14 = vector.broadcast %cst_7 : f32 to vector<8x8xf32>
    %15 = arith.cmpf ogt, %13, %14 : vector<8x8xf32>
    %16 = arith.extui %15 : vector<8x8xi1> to vector<8x8xi32>
    %17 = arith.sitofp %16 : vector<8x8xi32> to vector<8x8xf32>
    %c0_8 = arith.constant 0 : index
    %c0_9 = arith.constant 0 : index
    %c0_10 = arith.constant 0 : index
    %18 = vector.load %arg14[%c0_8, %c0_9, %c0_10] : memref<3x8x128xf32, #tpu.memory_space<vmem>>, vector<1x8x8xf32>
    %19 = vector.shape_cast %18 : vector<1x8x8xf32> to vector<8x8xf32>
    %20 = vector.shape_cast %12 : vector<8x8xf32> to vector<1x8x8xf32>
    tpu.vector_store %arg14[%c0_8, %c0_9, %c0_10], %20 {strides = array<i32>} : memref<3x8x128xf32, #tpu.memory_space<vmem>>, vector<1x8x8xf32>,
    %c0_11 = arith.constant 0 : index
    %c0_12 = arith.constant 0 : index
    %c8 = arith.constant 8 : index
    %21 = vector.load %arg14[%c0_11, %c0_12, %c8] : memref<3x8x128xf32, #tpu.memory_space<vmem>>, vector<1x8x8xf32>
    %22 = vector.shape_cast %21 : vector<1x8x8xf32> to vector<8x8xf32>
    %23 = vector.shape_cast %17 : vector<8x8xf32> to vector<1x8x8xf32>
    tpu.vector_store %arg14[%c0_11, %c0_12, %c8], %23 {strides = array<i32>} : memref<3x8x128xf32, #tpu.memory_space<vmem>>, vector<1x8x8xf32>,
    %cst_13 = arith.constant 1.000000e+00 : f32
    %24 = vector.broadcast %cst_13 : f32 to vector<8x8x128xf32>
    %cst_14 = arith.constant 1.000000e+00 : f32
    %25 = vector.broadcast %cst_14 : f32 to vector<8x8x128xf32>
    %c0_15 = arith.constant 0 : index
    %c0_16 = arith.constant 0 : index
    %26 = vector.load %arg1[%c0_15, %c0_16] : memref<8x128xf32, #tpu.memory_space<vmem>>, vector<8x128xf32>
    %c0_17 = arith.constant 0 : index
    %c0_18 = arith.constant 0 : index
    %27 = vector.load %arg3[%c0_17, %c0_18] : memref<8x128xf32, #tpu.memory_space<vmem>>, vector<8x128xf32>
    %c0_19 = arith.constant 0 : index
    %c0_20 = arith.constant 0 : index
    %28 = vector.load %arg4[%c0_19, %c0_20] : memref<8x128xf32, #tpu.memory_space<vmem>>, vector<8x128xf32>
    %cst_21 = arith.constant 1.000000e+00 : f32
    %29 = vector.broadcast %cst_21 : f32 to vector<8x128xf32>
    %30 = arith.subf %29, %26 : vector<8x128xf32>
    %31 = vector.shape_cast %30 : vector<8x128xf32> to vector<8x1x128xf32>
    %32 = vector.shape_cast %27 : vector<8x128xf32> to vector<1x8x128xf32>
    %33 = vector.broadcast %31 : vector<8x1x128xf32> to vector<8x8x128xf32>
    %34 = vector.broadcast %32 : vector<1x8x128xf32> to vector<8x8x128xf32>
    %35 = arith.mulf %33, %34 : vector<8x8x128xf32>
    %cst_22 = arith.constant 1.000000e+00 : f32
    %36 = vector.broadcast %cst_22 : f32 to vector<8x8x128xf32>
    %37 = arith.subf %36, %35 : vector<8x8x128xf32>
    %38 = arith.mulf %24, %37 : vector<8x8x128xf32>
    %39 = vector.shape_cast %26 : vector<8x128xf32> to vector<8x1x128xf32>
    %40 = vector.shape_cast %28 : vector<8x128xf32> to vector<1x8x128xf32>
    %41 = vector.broadcast %39 : vector<8x1x128xf32> to vector<8x8x128xf32>
    %42 = vector.broadcast %40 : vector<1x8x128xf32> to vector<8x8x128xf32>
    %43 = arith.mulf %41, %42 : vector<8x8x128xf32>
    %cst_23 = arith.constant 1.000000e+00 : f32
    %44 = vector.broadcast %cst_23 : f32 to vector<8x8x128xf32>
    %45 = arith.subf %44, %43 : vector<8x8x128xf32>
    %46 = arith.mulf %25, %45 : vector<8x8x128xf32>
    %cst_24 = arith.constant 9.99999991E-38 : f32
    %47 = vector.broadcast %cst_24 : f32 to vector<8x8x128xf32>
    %48 = arith.maximumf %38, %47 : vector<8x8x128xf32>
    %cst_25 = arith.constant 9.99999991E-38 : f32
    %49 = vector.broadcast %cst_25 : f32 to vector<8x8x128xf32>
    %50 = arith.maximumf %46, %49 : vector<8x8x128xf32>
    %51 = math.log %48 : vector<8x8x128xf32>
    %cst_26 = arith.constant dense<0.000000e+00> : vector<8x8xf32>
    %52 = vector.multi_reduction <add>, %51, %cst_26 [2] : vector<8x8x128xf32> to vector<8x8xf32>
    %53 = math.log %50 : vector<8x8x128xf32>
    %cst_27 = arith.constant dense<0.000000e+00> : vector<8x8xf32>
    %54 = vector.multi_reduction <add>, %53, %cst_27 [2] : vector<8x8x128xf32> to vector<8x8xf32>
    %cst_28 = arith.constant 1.000000e+00 : f32
    %55 = vector.broadcast %cst_28 : f32 to vector<8x8xf32>
    %56 = arith.subf %55, %52 : vector<8x8xf32>
    %57 = tpu.reciprocal %56 {approx = true} : vector<8x8xf32> -> vector<8x8xf32>
    %58 = arith.mulf %56, %57 : vector<8x8xf32>
    %cst_29 = arith.constant 2.000000e+00 : f32
    %59 = vector.broadcast %cst_29 : f32 to vector<8x8xf32>
    %60 = arith.subf %59, %58 : vector<8x8xf32>
    %61 = arith.mulf %57, %60 : vector<8x8xf32>
    %c0_30 = arith.constant 0 : index
    %c0_31 = arith.constant 0 : index
    %c0_32 = arith.constant 0 : index
    %62 = vector.load %arg13[%c0_30, %c0_31, %c0_32] : memref<3x8x128xf32, #tpu.memory_space<vmem>>, vector<1x8x8xf32>
    %63 = vector.shape_cast %62 : vector<1x8x8xf32> to vector<8x8xf32>
    %64 = vector.shape_cast %61 : vector<8x8xf32> to vector<1x8x8xf32>
    tpu.vector_store %arg13[%c0_30, %c0_31, %c0_32], %64 {strides = array<i32>} : memref<3x8x128xf32, #tpu.memory_space<vmem>>, vector<1x8x8xf32>,
    %cst_33 = arith.constant 1.000000e+00 : f32
    %65 = vector.broadcast %cst_33 : f32 to vector<8x8xf32>
    %66 = arith.subf %65, %54 : vector<8x8xf32>
    %67 = tpu.reciprocal %66 {approx = true} : vector<8x8xf32> -> vector<8x8xf32>
    %68 = arith.mulf %66, %67 : vector<8x8xf32>
    %cst_34 = arith.constant 2.000000e+00 : f32
    %69 = vector.broadcast %cst_34 : f32 to vector<8x8xf32>
    %70 = arith.subf %69, %68 : vector<8x8xf32>
    %71 = arith.mulf %67, %70 : vector<8x8xf32>
    %cst_35 = arith.constant 1.000000e+00 : f32
    %72 = vector.broadcast %cst_35 : f32 to vector<8x8xf32>
    %73 = arith.subf %72, %71 : vector<8x8xf32>
    %c0_36 = arith.constant 0 : index
    %c0_37 = arith.constant 0 : index
    %c8_38 = arith.constant 8 : index
    %74 = vector.load %arg13[%c0_36, %c0_37, %c8_38] : memref<3x8x128xf32, #tpu.memory_space<vmem>>, vector<1x8x8xf32>
    %75 = vector.shape_cast %74 : vector<1x8x8xf32> to vector<8x8xf32>
    %76 = vector.shape_cast %73 : vector<8x8xf32> to vector<1x8x8xf32>
    tpu.vector_store %arg13[%c0_36, %c0_37, %c8_38], %76 {strides = array<i32>} : memref<3x8x128xf32, #tpu.memory_space<vmem>>, vector<1x8x8xf32>,
    %77 = vector.extract_strided_slice %0 {offsets = [0, 0], sizes = [8, 112], strides = [1, 1]} : vector<8x128xf32> to vector<8x112xf32>
    %c0_39 = arith.constant 0 : index
    %c0_40 = arith.constant 0 : index
    %c16 = arith.constant 16 : index
    %78 = vector.load %arg13[%c0_39, %c0_40, %c16] : memref<3x8x128xf32, #tpu.memory_space<vmem>>, vector<1x8x112xf32>
    %79 = vector.shape_cast %78 : vector<1x8x112xf32> to vector<8x112xf32>
    %80 = vector.shape_cast %77 : vector<8x112xf32> to vector<1x8x112xf32>
    tpu.vector_store %arg13[%c0_39, %c0_40, %c16], %80 {strides = array<i32>} : memref<3x8x128xf32, #tpu.memory_space<vmem>>, vector<1x8x112xf32>,
    %81 = vector.extract_strided_slice %0 {offsets = [0, 0], sizes = [8, 112], strides = [1, 1]} : vector<8x128xf32> to vector<8x112xf32>
    %c0_41 = arith.constant 0 : index
    %c0_42 = arith.constant 0 : index
    %c16_43 = arith.constant 16 : index
    %82 = vector.load %arg14[%c0_41, %c0_42, %c16_43] : memref<3x8x128xf32, #tpu.memory_space<vmem>>, vector<1x8x112xf32>
    %83 = vector.shape_cast %82 : vector<1x8x112xf32> to vector<8x112xf32>
    %84 = vector.shape_cast %81 : vector<8x112xf32> to vector<1x8x112xf32>
    tpu.vector_store %arg14[%c0_41, %c0_42, %c16_43], %84 {strides = array<i32>} : memref<3x8x128xf32, #tpu.memory_space<vmem>>, vector<1x8x112xf32>,
    %c0_44 = arith.constant 0 : index
    %c0_45 = arith.constant 0 : index
    %c0_46 = arith.constant 0 : index
    %85 = vector.load %arg14[%c0_44, %c0_45, %c0_46] : memref<3x8x128xf32, #tpu.memory_space<vmem>>, vector<1x8x128xf32>
    %86 = vector.shape_cast %85 : vector<1x8x128xf32> to vector<8x128xf32>
    %87 = arith.truncf %86 : vector<8x128xf32> to vector<8x128xbf16>
    %c0_47 = arith.constant 0 : index
    %c0_48 = arith.constant 0 : index
    %88 = vector.load %arg9[%c0_47, %c0_48] : memref<256x8xbf16, #tpu.memory_space<vmem>>, vector<128x8xbf16>
    %cst_49 = arith.constant dense<0.000000e+00> : vector<8x8xf32>
    %89 = tpu.matmul %87, %88, %cst_49 {dimension_numbers = #tpu.dot_dimension_numbers<[1], [0], [0], [1], [0, 0, 1, 1], [], []>} : vector<8x128xbf16>, vector<128x8xbf16>, vector<8x8xf32> -> vector<8x8xf32>
    %c0_50 = arith.constant 0 : index
    %c0_51 = arith.constant 0 : index
    %90 = vector.load %arg2[%c0_50, %c0_51] : memref<8x128xf32, #tpu.memory_space<vmem>>, vector<8x128xf32>
    %91 = arith.truncf %90 : vector<8x128xf32> to vector<8x128xbf16>
    %c128 = arith.constant 128 : index
    %c0_52 = arith.constant 0 : index
    %92 = vector.load %arg9[%c128, %c0_52] : memref<256x8xbf16, #tpu.memory_space<vmem>>, vector<128x8xbf16>
    %cst_53 = arith.constant dense<0.000000e+00> : vector<8x8xf32>
    %93 = tpu.matmul %91, %92, %cst_53 {dimension_numbers = #tpu.dot_dimension_numbers<[1], [0], [0], [1], [0, 0, 1, 1], [], []>} : vector<8x128xbf16>, vector<128x8xbf16>, vector<8x8xf32> -> vector<8x8xf32>
    %94 = arith.addf %89, %93 : vector<8x8xf32>
    %c0_54 = arith.constant 0 : index
    %c0_55 = arith.constant 0 : index
    %95 = vector.load %arg10[%c0_54, %c0_55] : memref<1x128xf32, #tpu.memory_space<vmem>>, vector<1x4xf32>
    %96 = vector.extract_strided_slice %94 {offsets = [0, 0], sizes = [8, 4], strides = [1, 1]} : vector<8x8xf32> to vector<8x4xf32>
    %97 = vector.broadcast %95 : vector<1x4xf32> to vector<8x4xf32>
    %98 = arith.subf %97, %96 : vector<8x4xf32>
    %cst_56 = arith.constant 5.000000e-01 : f32
    %99 = vector.broadcast %cst_56 : f32 to vector<8x4xf32>
    %100 = arith.cmpf olt, %98, %99 : vector<8x4xf32>
    %101 = arith.extui %100 : vector<8x4xi1> to vector<8x4xi32>
    %102 = arith.sitofp %101 : vector<8x4xi32> to vector<8x4xf32>
    %103 = vector.extract_strided_slice %94 {offsets = [0, 4], sizes = [8, 4], strides = [1, 1]} : vector<8x8xf32> to vector<8x4xf32>
    %cst_57 = arith.constant 5.000000e-01 : f32
    %104 = vector.broadcast %cst_57 : f32 to vector<8x4xf32>
    %105 = arith.cmpf ogt, %103, %104 : vector<8x4xf32>
    %106 = arith.extui %105 : vector<8x4xi1> to vector<8x4xi32>
    %107 = arith.sitofp %106 : vector<8x4xi32> to vector<8x4xf32>
    %c0_58 = arith.constant 0 : index
    %c0_59 = arith.constant 0 : index
    %108 = vector.load %arg12[%c0_58, %c0_59] : memref<8x128xf32, #tpu.memory_space<vmem>>, vector<8x4xf32>
    tpu.vector_store %arg12[%c0_58, %c0_59], %102 {strides = array<i32>} : memref<8x128xf32, #tpu.memory_space<vmem>>, vector<8x4xf32>,
    %c0_60 = arith.constant 0 : index
    %c4 = arith.constant 4 : index
    %109 = vector.load %arg12[%c0_60, %c4] : memref<8x128xf32, #tpu.memory_space<vmem>>, vector<8x4xf32>
    tpu.vector_store %arg12[%c0_60, %c4], %107 {strides = array<i32>} : memref<8x128xf32, #tpu.memory_space<vmem>>, vector<8x4xf32>,
    %cst_61 = arith.constant 1.000000e+00 : f32
    %110 = vector.broadcast %cst_61 : f32 to vector<8x4x128xf32>
    %cst_62 = arith.constant 1.000000e+00 : f32
    %111 = vector.broadcast %cst_62 : f32 to vector<8x4x128xf32>
    %c0_63 = arith.constant 0 : index
    %c0_64 = arith.constant 0 : index
    %c0_65 = arith.constant 0 : index
    %112 = vector.load %arg13[%c0_63, %c0_64, %c0_65] : memref<3x8x128xf32, #tpu.memory_space<vmem>>, vector<1x8x128xf32>
    %113 = vector.shape_cast %112 : vector<1x8x128xf32> to vector<8x128xf32>
    %c0_66 = arith.constant 0 : index
    %c0_67 = arith.constant 0 : index
    %114 = vector.load %arg7[%c0_66, %c0_67] : memref<4x256xf32, #tpu.memory_space<vmem>>, vector<4x128xf32>
    %c0_68 = arith.constant 0 : index
    %c0_69 = arith.constant 0 : index
    %115 = vector.load %arg8[%c0_68, %c0_69] : memref<4x256xf32, #tpu.memory_space<vmem>>, vector<4x128xf32>
    %cst_70 = arith.constant 1.000000e+00 : f32
    %116 = vector.broadcast %cst_70 : f32 to vector<8x128xf32>
    %117 = arith.subf %116, %113 : vector<8x128xf32>
    %118 = vector.shape_cast %117 : vector<8x128xf32> to vector<8x1x128xf32>
    %119 = vector.shape_cast %114 : vector<4x128xf32> to vector<1x4x128xf32>
    %120 = vector.broadcast %118 : vector<8x1x128xf32> to vector<8x4x128xf32>
    %121 = vector.broadcast %119 : vector<1x4x128xf32> to vector<8x4x128xf32>
    %122 = arith.mulf %120, %121 : vector<8x4x128xf32>
    %cst_71 = arith.constant 1.000000e+00 : f32
    %123 = vector.broadcast %cst_71 : f32 to vector<8x4x128xf32>
    %124 = arith.subf %123, %122 : vector<8x4x128xf32>
    %125 = arith.mulf %110, %124 : vector<8x4x128xf32>
    %126 = vector.shape_cast %113 : vector<8x128xf32> to vector<8x1x128xf32>
    %127 = vector.shape_cast %115 : vector<4x128xf32> to vector<1x4x128xf32>
    %128 = vector.broadcast %126 : vector<8x1x128xf32> to vector<8x4x128xf32>
    %129 = vector.broadcast %127 : vector<1x4x128xf32> to vector<8x4x128xf32>
    %130 = arith.mulf %128, %129 : vector<8x4x128xf32>
    %cst_72 = arith.constant 1.000000e+00 : f32
    %131 = vector.broadcast %cst_72 : f32 to vector<8x4x128xf32>
    %132 = arith.subf %131, %130 : vector<8x4x128xf32>
    %133 = arith.mulf %111, %132 : vector<8x4x128xf32>
    %c0_73 = arith.constant 0 : index
    %c0_74 = arith.constant 0 : index
    %134 = vector.load %arg1[%c0_73, %c0_74] : memref<8x128xf32, #tpu.memory_space<vmem>>, vector<8x128xf32>
    %c0_75 = arith.constant 0 : index
    %c128_76 = arith.constant 128 : index
    %135 = vector.load %arg7[%c0_75, %c128_76] : memref<4x256xf32, #tpu.memory_space<vmem>>, vector<4x128xf32>
    %c0_77 = arith.constant 0 : index
    %c128_78 = arith.constant 128 : index
    %136 = vector.load %arg8[%c0_77, %c128_78] : memref<4x256xf32, #tpu.memory_space<vmem>>, vector<4x128xf32>
    %cst_79 = arith.constant 1.000000e+00 : f32
    %137 = vector.broadcast %cst_79 : f32 to vector<8x128xf32>
    %138 = arith.subf %137, %134 : vector<8x128xf32>
    %139 = vector.shape_cast %138 : vector<8x128xf32> to vector<8x1x128xf32>
    %140 = vector.shape_cast %135 : vector<4x128xf32> to vector<1x4x128xf32>
    %141 = vector.broadcast %139 : vector<8x1x128xf32> to vector<8x4x128xf32>
    %142 = vector.broadcast %140 : vector<1x4x128xf32> to vector<8x4x128xf32>
    %143 = arith.mulf %141, %142 : vector<8x4x128xf32>
    %cst_80 = arith.constant 1.000000e+00 : f32
    %144 = vector.broadcast %cst_80 : f32 to vector<8x4x128xf32>
    %145 = arith.subf %144, %143 : vector<8x4x128xf32>
    %146 = arith.mulf %125, %145 : vector<8x4x128xf32>
    %147 = vector.shape_cast %134 : vector<8x128xf32> to vector<8x1x128xf32>
    %148 = vector.shape_cast %136 : vector<4x128xf32> to vector<1x4x128xf32>
    %149 = vector.broadcast %147 : vector<8x1x128xf32> to vector<8x4x128xf32>
    %150 = vector.broadcast %148 : vector<1x4x128xf32> to vector<8x4x128xf32>
    %151 = arith.mulf %149, %150 : vector<8x4x128xf32>
    %cst_81 = arith.constant 1.000000e+00 : f32
    %152 = vector.broadcast %cst_81 : f32 to vector<8x4x128xf32>
    %153 = arith.subf %152, %151 : vector<8x4x128xf32>
    %154 = arith.mulf %133, %153 : vector<8x4x128xf32>
    %cst_82 = arith.constant 9.99999991E-38 : f32
    %155 = vector.broadcast %cst_82 : f32 to vector<8x4x128xf32>
    %156 = arith.maximumf %146, %155 : vector<8x4x128xf32>
    %cst_83 = arith.constant 9.99999991E-38 : f32
    %157 = vector.broadcast %cst_83 : f32 to vector<8x4x128xf32>
    %158 = arith.maximumf %154, %157 : vector<8x4x128xf32>
    %159 = math.log %156 : vector<8x4x128xf32>
    %cst_84 = arith.constant dense<0.000000e+00> : vector<8x4xf32>
    %160 = vector.multi_reduction <add>, %159, %cst_84 [2] : vector<8x4x128xf32> to vector<8x4xf32>
    %161 = math.log %158 : vector<8x4x128xf32>
    %cst_85 = arith.constant dense<0.000000e+00> : vector<8x4xf32>
    %162 = vector.multi_reduction <add>, %161, %cst_85 [2] : vector<8x4x128xf32> to vector<8x4xf32>
    %cst_86 = arith.constant 1.000000e+00 : f32
    %163 = vector.broadcast %cst_86 : f32 to vector<8x4xf32>
    %164 = arith.subf %163, %160 : vector<8x4xf32>
    %165 = tpu.reciprocal %164 {approx = true} : vector<8x4xf32> -> vector<8x4xf32>
    %166 = arith.mulf %164, %165 : vector<8x4xf32>
    %cst_87 = arith.constant 2.000000e+00 : f32
    %167 = vector.broadcast %cst_87 : f32 to vector<8x4xf32>
    %168 = arith.subf %167, %166 : vector<8x4xf32>
    %169 = arith.mulf %165, %168 : vector<8x4xf32>
    %c0_88 = arith.constant 0 : index
    %c0_89 = arith.constant 0 : index
    %170 = vector.load %arg11[%c0_88, %c0_89] : memref<8x128xf32, #tpu.memory_space<vmem>>, vector<8x4xf32>
    tpu.vector_store %arg11[%c0_88, %c0_89], %169 {strides = array<i32>} : memref<8x128xf32, #tpu.memory_space<vmem>>, vector<8x4xf32>,
    %cst_90 = arith.constant 1.000000e+00 : f32
    %171 = vector.broadcast %cst_90 : f32 to vector<8x4xf32>
    %172 = arith.subf %171, %162 : vector<8x4xf32>
    %173 = tpu.reciprocal %172 {approx = true} : vector<8x4xf32> -> vector<8x4xf32>
    %174 = arith.mulf %172, %173 : vector<8x4xf32>
    %cst_91 = arith.constant 2.000000e+00 : f32
    %175 = vector.broadcast %cst_91 : f32 to vector<8x4xf32>
    %176 = arith.subf %175, %174 : vector<8x4xf32>
    %177 = arith.mulf %173, %176 : vector<8x4xf32>
    %cst_92 = arith.constant 1.000000e+00 : f32
    %178 = vector.broadcast %cst_92 : f32 to vector<8x4xf32>
    %179 = arith.subf %178, %177 : vector<8x4xf32>
    %c0_93 = arith.constant 0 : index
    %c4_94 = arith.constant 4 : index
    %180 = vector.load %arg11[%c0_93, %c4_94] : memref<8x128xf32, #tpu.memory_space<vmem>>, vector<8x4xf32>
    tpu.vector_store %arg11[%c0_93, %c4_94], %179 {strides = array<i32>} : memref<8x128xf32, #tpu.memory_space<vmem>>, vector<8x4xf32>,
    %181 = vector.extract_strided_slice %0 {offsets = [0, 0], sizes = [8, 120], strides = [1, 1]} : vector<8x128xf32> to vector<8x120xf32>
    %c0_95 = arith.constant 0 : index
    %c8_96 = arith.constant 8 : index
    %182 = vector.load %arg11[%c0_95, %c8_96] : memref<8x128xf32, #tpu.memory_space<vmem>>, vector<8x120xf32>
    tpu.vector_store %arg11[%c0_95, %c8_96], %181 {strides = array<i32>} : memref<8x128xf32, #tpu.memory_space<vmem>>, vector<8x120xf32>,
    %183 = vector.extract_strided_slice %0 {offsets = [0, 0], sizes = [8, 120], strides = [1, 1]} : vector<8x128xf32> to vector<8x120xf32>
    %c0_97 = arith.constant 0 : index
    %c8_98 = arith.constant 8 : index
    %184 = vector.load %arg12[%c0_97, %c8_98] : memref<8x128xf32, #tpu.memory_space<vmem>>, vector<8x120xf32>
    tpu.vector_store %arg12[%c0_97, %c8_98], %183 {strides = array<i32>} : memref<8x128xf32, #tpu.memory_space<vmem>>, vector<8x120xf32>,
    return
  }
  func.func @transform_0(%arg0: i32) -> (i32, i32) {
    %c0_i32 = arith.constant 0 : i32
    %c0_i32_0 = arith.constant 0 : i32
    return %arg0, %c0_i32 : i32, i32
  }
  func.func @transform_1(%arg0: i32) -> (i32, i32) {
    %c0_i32 = arith.constant 0 : i32
    %c0_i32_0 = arith.constant 0 : i32
    return %arg0, %c0_i32 : i32, i32
  }
  func.func @transform_2(%arg0: i32) -> (i32, i32) {
    %c0_i32 = arith.constant 0 : i32
    %c0_i32_0 = arith.constant 0 : i32
    %c0_i32_1 = arith.constant 0 : i32
    return %c0_i32, %c0_i32_0 : i32, i32
  }
  func.func @transform_3(%arg0: i32) -> (i32, i32) {
    %c0_i32 = arith.constant 0 : i32
    %c0_i32_0 = arith.constant 0 : i32
    %c0_i32_1 = arith.constant 0 : i32
    return %c0_i32, %c0_i32_0 : i32, i32
  }
  func.func @transform_4(%arg0: i32) -> (i32, i32) {
    %c0_i32 = arith.constant 0 : i32
    %c0_i32_0 = arith.constant 0 : i32
    %c0_i32_1 = arith.constant 0 : i32
    return %c0_i32, %c0_i32_0 : i32, i32
  }
  func.func @transform_5(%arg0: i32) -> (i32, i32) {
    %c0_i32 = arith.constant 0 : i32
    %c0_i32_0 = arith.constant 0 : i32
    %c0_i32_1 = arith.constant 0 : i32
    return %c0_i32, %c0_i32_0 : i32, i32
  }
  func.func @transform_6(%arg0: i32) -> (i32, i32) {
    %c0_i32 = arith.constant 0 : i32
    %c0_i32_0 = arith.constant 0 : i32
    %c0_i32_1 = arith.constant 0 : i32
    return %c0_i32, %c0_i32_0 : i32, i32
  }
  func.func @transform_7(%arg0: i32) -> (i32, i32) {
    %c0_i32 = arith.constant 0 : i32
    %c0_i32_0 = arith.constant 0 : i32
    %c0_i32_1 = arith.constant 0 : i32
    return %c0_i32, %c0_i32_0 : i32, i32
  }
  func.func @transform_8(%arg0: i32) -> (i32, i32) {
    %c0_i32 = arith.constant 0 : i32
    %c0_i32_0 = arith.constant 0 : i32
    %c0_i32_1 = arith.constant 0 : i32
    return %c0_i32, %c0_i32_0 : i32, i32
  }
  func.func @transform_9(%arg0: i32) -> (i32, i32) {
    %c0_i32 = arith.constant 0 : i32
    %c0_i32_0 = arith.constant 0 : i32
    %c0_i32_1 = arith.constant 0 : i32
    return %c0_i32, %c0_i32_0 : i32, i32
  }
  func.func @transform_10(%arg0: i32) -> (i32, i32) {
    %c0_i32 = arith.constant 0 : i32
    %c0_i32_0 = arith.constant 0 : i32
    return %arg0, %c0_i32 : i32, i32
  }
  func.func @transform_11(%arg0: i32) -> (i32, i32) {
    %c0_i32 = arith.constant 0 : i32
    %c0_i32_0 = arith.constant 0 : i32
    return %arg0, %c0_i32 : i32, i32
  }
}

</mosaic_0001>

<bundles_post_ra>
// kernel: tpu_custom_call.1
= control target key start
LH: loop header
LB: loop body
LE: loop exit
PB: predicated region body
PF: predicated region fallthrough
CT: control target
= control target key end

     0   :  { %17 = vsyncpa [#allocation5], 0  ;;  %s1899_s0 = inlined_call_operand.vmem [shape: f32[8,128], index: 0, kind: input, shape index: {}]   ;;  %s1900_s1 = inlined_call_operand.vmem [shape: f32[8,128], index: 1, kind: input, shape index: {}]   ;;  %s1901_s2 = inlined_call_operand.vmem [shape: f32[8,128], index: 2, kind: input, shape index: {}]   ;;  %s1902_s3 = inlined_call_operand.vmem [shape: f32[8,128], index: 3, kind: input, shape index: {}]   ;;  %s1903_s4 = inlined_call_operand.vmem [shape: bf16[128,16], index: 4, kind: input, shape index: {}]   ;;  %s1904_s5 = inlined_call_operand.vmem [shape: f32[1,128], index: 5, kind: input, shape index: {}]   ;;  %s1905_s6 = inlined_call_operand.vmem [shape: f32[4,256], index: 6, kind: input, shape index: {}]   ;;  %s1906_s7 = inlined_call_operand.vmem [shape: f32[4,256], index: 7, kind: input, shape index: {}]   ;;  %s1907_s8 = inlined_call_operand.vmem [shape: bf16[256,8], index: 8, kind: input, shape index: {}]   ;;  %s1908_s9 = inlined_call_operand.vmem [shape: f32[1,128], index: 9, kind: input, shape index: {}]   ;;  %s1909_s10 = inlined_call_operand.hbm [shape: f32[8,128], index: 10, kind: output, shape index: {0}]   ;;  %s1910_s11 = inlined_call_operand.hbm [shape: f32[8,128], index: 11, kind: output, shape index: {1}]  }
   0x1   :  { %v1451_v0 = vld [vmem:[%s1899_s0] sm:$0xff] }
   0x2   :  { %v1456_v1 = vld [vmem:[%s1902_s3] sm:$0xff]  ;;  %v185_v2 = vperm.slane %v1451_v0, 0  ;;  %v179_v3 = vrot.slane %v1451_v0, 2  ;;  %v1461_v4 = vsub.f32 1.0, %v1451_v0  ;;  %v178_v5 = vrot.slane %v1451_v0, 1 }
   0x3   :  { %v1467_v6 = vld [vmem:[%s1901_s2] sm:$0xff]  ;;  %v181_v7 = vrot.slane %v1451_v0, 4  ;;  %v180_v8 = vrot.slane %v1451_v0, 3 }
   0x4   :  { %v201_v9 = vmul.f32 %v185_v2, %v1456_v1  ;;  %v1474_v10 = vperm.slane %v179_v3, 0  ;;  %v145_v11 = vperm.slane %v1461_v4, 0  ;;  %v1477_v12 = vperm.slane %v178_v5, 0 }
   0x5   :  { %18 = vsyncpa [#allocation7], 0  ;;  %v1479_v13 = vperm.slane %v181_v7, 0  ;;  %v138_v14 = vrot.slane %v1461_v4, 1  ;;  %v1482_v15 = vperm.slane %v180_v8, 0  ;;  %v139_v16 = vrot.slane %v1461_v4, 2 }
   0x6   :  { %v209_v17 = vsub.f32 1.0, %v201_v9  ;;  %v203_v18 = vmul.f32 %v1474_v10, %v1456_v1  ;;  %v161_v19 = vmul.f32 %v145_v11, %v1467_v6  ;;  %v202_v20 = vmul.f32 %v1477_v12, %v1456_v1  ;;  %s1386_s30 = smov [#allocation6]   ;;  %s1062_s14 = sshll.u32 %s1910_s11, 4  ;;  %s1063_s14 = int_to_ptr.hbm [resolvable:$true] %s1062_s14 }
   0x7   :  { %v205_v21 = vmul.f32 %v1479_v13, %v1456_v1  ;;  %v1494_v22 = vperm.slane %v138_v14, 0  ;;  %v1496_v23 = vperm.slane %v139_v16, 0  ;;  %v204_v30 = vmul.f32 %v1482_v15, %v1456_v1  ;;  %s1387_s11 = smov [#allocation4]  }
   0x8   :  { %v225_v24 = vmax.f32 %v209_v17, 1e-37  ;;  %v211_v25 = vsub.f32 1.0, %v203_v18  ;;  %v169_v26 = vsub.f32 1.0, %v161_v19  ;;  %v210_v27 = vsub.f32 1.0, %v202_v20  ;;  %s1049_s15 = sshll.u32 %s1387_s11, 4  ;;  %s1050_s15 = int_to_ptr.vmem [resolvable:$true] %s1049_s15 }
   0x9   :  { %v213_v28 = vsub.f32 1.0, %v205_v21  ;;  %v162_v29 = vmul.f32 %v1494_v22, %v1467_v6  ;;  %v163_v36 = vmul.f32 %v1496_v23, %v1467_v6  ;;  %v140_v37 = vrot.slane %v1461_v4, 3 }
   0xa   :  { %1205 = vlog2.f32 %v225_v24  ;;  %v227_v31 = vmax.f32 %v211_v25, 1e-37  ;;  %v217_v32 = vmax.f32 %v169_v26, 1e-37  ;;  %v226_v33 = vmax.f32 %v210_v27, 1e-37 }
   0xb   :  { %v229_v34 = vmax.f32 %v213_v28, 1e-37  ;;  %v170_v35 = vsub.f32 1.0, %v162_v29  ;;  %v141_v38 = vrot.slane %v1461_v4, 4  ;;  %v142_v39 = vrot.slane %v1461_v4, 5  ;;  %v1183_v28 = vld [vmem:[%s1903_s4 + $0x38] sm:$0xff] }
   0xc   :  { %1207 = vlog2.f32 %v227_v31  ;;  %v182_v41 = vrot.slane %v1451_v0, 5  ;;  %v212_v42 = vsub.f32 1.0, %v204_v30  ;;  %v1508_v43 = vperm.slane %v140_v37, 0  ;;  %105 = vmatpush.bf16.msra.mxu0 %v1183_v28 }
   0xd   :  { %1209 = vlog2.f32 %v217_v32  ;;  %v218_v40 = vmax.f32 %v170_v35, 1e-37  ;;  %v1510_v44 = vperm.slane %v141_v38, 0  ;;  %v171_v46 = vsub.f32 1.0, %v163_v36 }
   0xe   :  { %1211 = vlog2.f32 %v226_v33  ;;  %v164_v47 = vmul.f32 %v1508_v43, %v1467_v6  ;;  %v1514_v48 = vperm.slane %v142_v39, 0  ;;  %v1516_v50 = vperm.slane %v182_v41, 0 }
   0xf   :  { %1213 = vlog2.f32 %v229_v34  ;;  %v228_v52 = vmax.f32 %v212_v42, 1e-37  ;;  %v165_v54 = vmul.f32 %v1510_v44, %v1467_v6  ;;  %v183_v55 = vrot.slane %v1451_v0, 6  ;;  %v1182_v34 = vld [vmem:[%s1903_s4 + $0x30] sm:$0xff]  ;;  %v1181_v42 = vld [vmem:[%s1903_s4 + $0x28] sm:$0xff] }
  0x10   :  { %v1206_v45 = vpop.eup %1205  ;;  %1215 = vlog2.f32 %v218_v40  ;;  %v172_v53 = vsub.f32 1.0, %v164_v47  ;;  %v219_v60 = vmax.f32 %v171_v46, 1e-37  ;;  %v166_v61 = vmul.f32 %v1514_v48, %v1467_v6  ;;  %106 = vmatpush.bf16.msra.mxu0 %v1182_v34 }
  0x11   :  { %v266_v49 = vmul.f32 0.6931472, %v1206_v45  ;;  %v184_v62 = vrot.slane %v1451_v0, 7  ;;  %v206_v3 = vmul.f32 %v1516_v50, %v1456_v1  ;;  %1217 = vlog2.f32 %v228_v52 }
  0x12   :  { %v1208_v51 = vpop.eup %1207  ;;  %v220_v63 = vmax.f32 %v172_v53, 1e-37  ;;  %v173_v7 = vsub.f32 1.0, %v165_v54  ;;  %v1526_v8 = vperm.slane %v183_v55, 0  ;;  %v143_v9 = vrot.slane %v1461_v4, 6  ;;  %v1180_v53 = vld [vmem:[%s1903_s4 + $0x20] sm:$0xff] }
  0x13   :  { %v1210_v56 = vpop.eup %1209  ;;  %281 = vadd.xlane.f32.xlu0 %v266_v49  ;;  %v270_v57 = vmul.f32 0.6931472, %v1208_v51  ;;  %1219 = vlog2.f32 %v219_v60  ;;  %v174_v17 = vsub.f32 1.0, %v166_v61  ;;  %v1529_v18 = vperm.slane %v184_v62, 0  ;;  %v1178_v62 = vld [vmem:[%s1903_s4 + $0x10] sm:$0xff] }
  0x14   :  { %v1212_v58 = vpop.eup %1211  ;;  %v234_v59 = vmul.f32 0.6931472, %v1210_v56  ;;  %1221 = vlog2.f32 %v220_v63  ;;  %v214_v20 = vsub.f32 1.0, %v206_v3  ;;  %v1531_v21 = vperm.slane %v143_v9, 0  ;;  %107 = vmatpush.bf16.msra.mxu0 %v1181_v42  ;;  %v1177_v9 = vld [vmem:[%s1903_s4 + $0x8] sm:$0xff] }
  0x15   :  { %285 = vadd.xlane.f32.xlu2 %v270_v57  ;;  %v1214_v5 = vpop.eup %1213  ;;  %v268_v16 = vmul.f32 0.6931472, %v1212_v58  ;;  %v221_v25 = vmax.f32 %v173_v7, 1e-37  ;;  %v207_v26 = vmul.f32 %v1526_v8, %v1456_v1  ;;  %v144_v27 = vrot.slane %v1461_v4, 7 }
  0x16   :  { %249 = vadd.xlane.f32.xlu1 %v234_v59  ;;  %v1216_v14 = vpop.eup %1215  ;;  %v274_v19 = vmul.f32 0.6931472, %v1214_v5  ;;  %v222_v30 = vmax.f32 %v174_v17, 1e-37  ;;  %v208_v31 = vmul.f32 %v1529_v18, %v1456_v1  ;;  %v230_v32 = vmax.f32 %v214_v20, 1e-37 }
  0x17   :  { %v236_v24 = vmul.f32 0.6931472, %v1216_v14  ;;  %v1218_v29 = vpop.eup %1217  ;;  %v167_v33 = vmul.f32 %v1531_v21, %v1467_v6  ;;  %1223 = vlog2.f32 %v221_v25  ;;  %v215_v36 = vsub.f32 1.0, %v207_v26  ;;  %v1176_v17 = vld [vmem:[%s1903_s4] sm:$0xff] }
  0x18   :  { %v1546_v37 = vperm.slane %v144_v27, 0  ;;  %v272_v39 = vmul.f32 0.6931472, %v1218_v29  ;;  %1225 = vlog2.f32 %v222_v30  ;;  %v216_v1 = vsub.f32 1.0, %v208_v31  ;;  %108 = vmatpush.bf16.msra.mxu0 %v1180_v53 }
  0x19   :  { %v1220_v35 = vpop.eup %1219  ;;  %1227 = vlog2.f32 %v230_v32  ;;  %v175_v41 = vsub.f32 1.0, %v167_v33  ;;  %v231_v46 = vmax.f32 %v215_v36, 1e-37  ;;  %vm355_vm0 = vcmask 1041409  }
  0x1a   :  { %v1222_v38 = vpop.eup %1221  ;;  %v238_v40 = vmul.f32 0.6931472, %v1220_v35  ;;  %v168_v47 = vmul.f32 %v1546_v37, %v1467_v6  ;;  %v232_v51 = vmax.f32 %v216_v1, 1e-37  ;;  %v1179_v6 = vld [vmem:[%s1903_s4 + $0x18] sm:$0xff]  ;;  %vm357_vm1 = vcmask 1042434  }
  0x1b   :  { %283 = vadd.xlane.f32.xlu0 %v268_v16  ;;  %v240_v45 = vmul.f32 0.6931472, %v1222_v38  ;;  %v223_v52 = vmax.f32 %v175_v41, 1e-37  ;;  %1229 = vlog2.f32 %v231_v46  ;;  %vm359_vm2 = vcmask 1043459  }
  0x1c   :  { %v176_v55 = vsub.f32 1.0, %v168_v47  ;;  %1231 = vlog2.f32 %v232_v51  ;;  %109 = vmatpush.bf16.msra.mxu0 %v1179_v6  ;;  %vm361_vm3 = vcmask 1044484   ;;  %vm363_vm4 = vcmask 1045509  }
  0x1d   :  { %289 = vadd.xlane.f32.xlu2 %v274_v19  ;;  %v1224_v49 = vpop.eup %1223  ;;  %1233 = vlog2.f32 %v223_v52  ;;  %v39_v19 = vld [vmem:[%s1900_s1] sm:$0xff]  ;;  %vm365_vm5 = vcmask 1046534   ;;  %vm367_vm6 = vcmask 1047559   ;;  %vm129_vm7 = vcmask 64512  }
  0x1e   :  { %251 = vadd.xlane.f32.xlu1 %v236_v24  ;;  %v1226_v54 = vpop.eup %1225  ;;  %v242_v57 = vmul.f32 0.6931472, %v1224_v49  ;;  %v224_v60 = vmax.f32 %v176_v55, 1e-37  ;;  %v1571_v24 = vpack.c.bf16 %v39_v19, %v39_v19  ;;  %vm131_vm8 = vcmask 130112  }
  0x1f   :  { %v1228_v56 = vpop.eup %1227  ;;  %v244_v58 = vmul.f32 0.6931472, %v1226_v54  ;;  %vm445_vm9 = vcmask 1047680   ;;  %vm837_vm12 = vcmask 1043456   ;;  %vm617_vm14 = vcmask 31744  }
  0x20   :  { %v276_v59 = vmul.f32 0.6931472, %v1228_v56  ;;  %1235 = vlog2.f32 %v224_v60  ;;  %110 = vmatpush.bf16.msra.mxu0 %v1178_v62  ;;  %v1191_v62 = vld [vmem:[%s1907_s8 + $0x38] sm:$0xff] }
  0x21   :  { %v1230_v61 = vpop.eup %1229  ;;  %593 = vmatpush.bf16.msra.mxu2 %v1191_v62 }
  0x22   :  { %v1232_v63 = vpop.eup %1231  ;;  %v278_v5 = vmul.f32 0.6931472, %v1230_v61 }
  0x23   :  { %287 = vadd.xlane.f32.xlu0 %v272_v39  ;;  %v1234_v3 = vpop.eup %1233  ;;  %v280_v7 = vmul.f32 0.6931472, %v1232_v63 }
  0x24   :  { %v246_v14 = vmul.f32 0.6931472, %v1234_v3  ;;  %111 = vmatpush.bf16.msra.mxu0 %v1177_v9 }
  0x25   :  { %253 = vadd.xlane.f32.xlu2 %v238_v40 }
  0x26   :  { %255 = vadd.xlane.f32.xlu1 %v240_v45  ;;  %v1236_v16 = vpop.eup %1235 }
  0x27   :  { %v248_v20 = vmul.f32 0.6931472, %v1236_v16 }
  0x28   :  { %112 = vmatpush.bf16.msra.mxu0 %v1176_v17 }
  0x2b   :  { %257 = vadd.xlane.f32.xlu0 %v242_v57  ;;  %113 = vmatmul.bf16.vlgmr.msra.gmra.mxu0 %v1571_v24  ;;  %v345_v57 = vlaneseq }
  0x2d   :  { %259 = vadd.xlane.f32.xlu2 %v244_v58 }
  0x2e   :  { %291 = vadd.xlane.f32.xlu1 %v276_v59 }
  0x33   :  { %293 = vadd.xlane.f32.xlu0 %v278_v5 }
  0x35   :  { %295 = vadd.xlane.f32.xlu2 %v280_v7 }
  0x36   :  { %261 = vadd.xlane.f32.xlu1 %v246_v14  ;;  %v1577_v14 = vand.u32 127, %v345_v57 }
  0x3b   :  { %263 = vadd.xlane.f32.xlu0 %v248_v20 }
  0x86   :  { %v282_v25 = vpop.xlane.xlu0 %281 }
  0x87   :  { %v371_v31 = vsub.f32 1.0, %v282_v25 }
  0x88   :  { %v286_v26 = vpop.xlane.xlu2 %285 }
  0x89   :  { %v250_v27 = vpop.xlane.xlu1 %249  ;;  %v373_v33 = vsub.f32 1.0, %v286_v26  ;;  %1237 = vrcp.f32 %v371_v31 }
  0x8a   :  { %v297_v34 = vsub.f32 1.0, %v250_v27 }
  0x8e   :  { %v284_v28 = vpop.xlane.xlu0 %283 }
  0x8f   :  { %v372_v32 = vsub.f32 1.0, %v284_v28  ;;  %v1238_v42 = vpop.eup %1237 }
  0x90   :  { %v290_v29 = vpop.xlane.xlu2 %289  ;;  %v387_v53 = vmul.f32 %v1238_v42, %v371_v31 }
  0x91   :  { %v252_v30 = vpop.xlane.xlu1 %251  ;;  %1239 = vrcp.f32 %v372_v32  ;;  %v375_v1 = vsub.f32 1.0, %v290_v29 }
  0x92   :  { %v298_v36 = vsub.f32 1.0, %v252_v30  ;;  %1241 = vrcp.f32 %v373_v33  ;;  %v395_v3 = vsub.f32 2.0, %v387_v53 }
  0x93   :  { %1243 = vrcp.f32 %v297_v34 }
  0x94   :  { %1245 = vrcp.f32 %v298_v36  ;;  %v403_v30 = vmul.f32 %v1238_v42, %v395_v3 }
  0x96   :  { %v288_v35 = vpop.xlane.xlu0 %287 }
  0x97   :  { %v374_v38 = vsub.f32 1.0, %v288_v35  ;;  %v1240_v46 = vpop.eup %1239 }
  0x98   :  { %v254_v39 = vpop.xlane.xlu2 %253  ;;  %v1242_v49 = vpop.eup %1241  ;;  %v388_v54 = vmul.f32 %v1240_v46, %v372_v32 }
  0x99   :  { %v256_v40 = vpop.xlane.xlu1 %255  ;;  %v299_v41 = vsub.f32 1.0, %v254_v39  ;;  %1247 = vrcp.f32 %v374_v38  ;;  %v1244_v52 = vpop.eup %1243  ;;  %v389_v60 = vmul.f32 %v1242_v49, %v373_v33 }
  0x9a   :  { %v300_v45 = vsub.f32 1.0, %v256_v40  ;;  %1249 = vrcp.f32 %v375_v1  ;;  %v1246_v56 = vpop.eup %1245  ;;  %v396_v5 = vsub.f32 2.0, %v388_v54  ;;  %v313_v20 = vmul.f32 %v1244_v52, %v297_v34 }
  0x9b   :  { %1251 = vrcp.f32 %v299_v41  ;;  %v314_v7 = vmul.f32 %v1246_v56, %v298_v36  ;;  %v397_v19 = vsub.f32 2.0, %v389_v60  ;;  %v1580_v40 = vadd.s32 4294967288, %v1577_v14 }
  0x9c   :  { %1253 = vrcp.f32 %v300_v45  ;;  %v404_v31 = vmul.f32 %v1240_v46, %v396_v5  ;;  %v321_v34 = vsub.f32 2.0, %v313_v20  ;;  %v411_v46 = vsub.f32 1.0, %v403_v30 }
  0x9d   :  { %v322_v32 = vsub.f32 2.0, %v314_v7 }
  0x9e   :  { %v258_v47 = vpop.xlane.xlu0 %257  ;;  %v412_v57 = vsub.f32 1.0, %v404_v31  ;;  %v329_v5 = vmul.f32 %v1244_v52, %v321_v34 }
  0x9f   :  { %v301_v51 = vsub.f32 1.0, %v258_v47  ;;  %v1248_v59 = vpop.eup %1247  ;;  %v405_v47 = vmul.f32 %v1242_v49, %v397_v19 }
  0xa0   :  { %v260_v55 = vpop.xlane.xlu2 %259  ;;  %v1250_v61 = vpop.eup %1249  ;;  %v390_v16 = vmul.f32 %v1248_v59, %v374_v38 }
  0xa1   :  { %v302_v58 = vsub.f32 1.0, %v260_v55  ;;  %v292_v6 = vpop.xlane.xlu1 %291  ;;  %1255 = vrcp.f32 %v301_v51  ;;  %v1252_v63 = vpop.eup %1251  ;;  %v391_v25 = vmul.f32 %v1250_v61, %v375_v1  ;;  %v413_v3 = vsub.f32 1.0, %v405_v47 }
  0xa2   :  { %v376_v9 = vsub.f32 1.0, %v292_v6  ;;  %v1254_v17 = vpop.eup %1253  ;;  %v315_v27 = vmul.f32 %v1252_v63, %v299_v41  ;;  %v398_v35 = vsub.f32 2.0, %v390_v16  ;;  %v330_v6 = vmul.f32 %v1246_v56, %v322_v32 }
  0xa3   :  { %1257 = vrcp.f32 %v302_v58  ;;  %v316_v36 = vmul.f32 %v1254_v17, %v300_v45  ;;  %v399_v1 = vsub.f32 2.0, %v391_v25  ;;  %v429_v56 = vperm.slane %v412_v57, %v1580_v40 }
  0xa4   :  { %1259 = vrcp.f32 %v376_v9  ;;  %v323_v54 = vsub.f32 2.0, %v315_v27  ;;  %v406_v45 = vmul.f32 %v1248_v59, %v398_v35  ;;  %v428_v27 = vperm.slane %v411_v46, %v1580_v40 }
  0xa5   :  { %v324_v60 = vsub.f32 2.0, %v316_v36  ;;  %v407_v49 = vmul.f32 %v1250_v61, %v399_v1  ;;  %v348_v59 = vperm.slane %v330_v6, %v1577_v14  ;;  %v430_v36 = vperm.slane %v413_v3, %v1580_v40 }
  0xa6   :  { %v294_v26 = vpop.xlane.xlu0 %293  ;;  %v414_v31 = vsub.f32 1.0, %v406_v45  ;;  %v436_v1 = vsel %vm355_vm0, %v429_v56, %v428_v27 }
  0xa7   :  { %v377_v28 = vsub.f32 1.0, %v294_v26  ;;  %v1256_v29 = vpop.eup %1255  ;;  %v332_v32 = vmul.f32 %v1254_v17, %v324_v60 }
  0xa8   :  { %v296_v33 = vpop.xlane.xlu2 %295  ;;  %v317_v41 = vmul.f32 %v1256_v29, %v301_v51  ;;  %v331_v51 = vmul.f32 %v1252_v63, %v323_v54 }
  0xa9   :  { %1261 = vrcp.f32 %v377_v28  ;;  %v378_v39 = vsub.f32 1.0, %v296_v33  ;;  %v262_v38 = vpop.xlane.xlu1 %261  ;;  %v1258_v53 = vpop.eup %1257  ;;  %v350_v46 = vperm.slane %v332_v32, %v1577_v14 }
  0xaa   :  { %v303_v55 = vsub.f32 1.0, %v262_v38  ;;  %v1260_v42 = vpop.eup %1259  ;;  %v318_v7 = vmul.f32 %v1258_v53, %v302_v58  ;;  %v325_v20 = vsub.f32 2.0, %v317_v41  ;;  %v347_v58 = vperm.slane %v329_v5, %v1577_v14 }
  0xab   :  { %1263 = vrcp.f32 %v378_v39  ;;  %v392_v62 = vmul.f32 %v1260_v42, %v376_v9  ;;  %v415_v38 = vsub.f32 1.0, %v407_v49  ;;  %v349_v47 = vperm.slane %v331_v51, %v1577_v14 }
  0xac   :  { %1265 = vrcp.f32 %v303_v55  ;;  %v326_v61 = vsub.f32 2.0, %v318_v7  ;;  %v333_v34 = vmul.f32 %v1256_v29, %v325_v20  ;;  %v356_v17 = vsel %vm355_vm0, %v348_v59, %v347_v58 }
  0xad   :  { %v400_v25 = vsub.f32 2.0, %v392_v62  ;;  %v358_v3 = vsel %vm357_vm1, %v349_v47, %v356_v17  ;;  %v437_v5 = vsel %vm357_vm1, %v430_v36, %v436_v1  ;;  %v432_v7 = vperm.slane %v415_v38, %v1580_v40  ;;  %v1624_v36 = vld [vmem:[%s1905_s6 + $0x4] sm:$0xf]  ;;  %v1199_v38 = vld [vmem:[%s1907_s8 + $0x78] sm:$0xff]  ;;  %v1189_v47 = vld [vmem:[%s1907_s8 + $0x28] sm:$0xff] }
  0xae   :  { %v264_v16 = vpop.xlane.xlu0 %263  ;;  %v351_v29 = vperm.slane %v333_v34, %v1577_v14  ;;  %v360_v51 = vsel %vm359_vm2, %v350_v46, %v358_v3  ;;  %v1385_v34 = vmov 0.0   ;;  %532 = vmatpush.bf16.msra.mxu1 %v1199_v38 }
  0xaf   :  { %v1262_v19 = vpop.eup %1261  ;;  %v304_v26 = vsub.f32 1.0, %v264_v16  ;;  %v408_v52 = vmul.f32 %v1260_v42, %v400_v25  ;;  %v431_v42 = vperm.slane %v414_v31, %v1580_v40 }
  0xb0   :  { %v393_v30 = vmul.f32 %v1262_v19, %v377_v28  ;;  %v362_v56 = vsel %vm361_vm3, %v351_v29, %v360_v51 }
  0xb1   :  { %v1264_v9 = vpop.eup %1263  ;;  %1267 = vrcp.f32 %v304_v26  ;;  %v416_v57 = vsub.f32 1.0, %v408_v52  ;;  %v438_v16 = vsel %vm359_vm2, %v431_v42, %v437_v5  ;;  %v1708_v5 = vmul.f32 %v1624_v36, %v1508_v43  ;;  %v1726_v43 = vld [vmem:[%s1905_s6] sm:$0xf] }
  0xb2   :  { %v401_v33 = vsub.f32 2.0, %v393_v30  ;;  %v394_v63 = vmul.f32 %v1264_v9, %v378_v39  ;;  %v1266_v35 = vpop.eup %1265  ;;  %v334_v39 = vmul.f32 %v1258_v53, %v326_v61  ;;  %v439_v59 = vsel %vm361_vm3, %v432_v7, %v438_v16 }
  0xb3   :  { %v319_v41 = vmul.f32 %v1266_v35, %v303_v55 }
  0xb4   :  { %v409_v28 = vmul.f32 %v1262_v19, %v401_v33  ;;  %v402_v54 = vsub.f32 2.0, %v394_v63  ;;  %v433_v19 = vperm.slane %v416_v57, %v1580_v40  ;;  %v352_v20 = vperm.slane %v334_v39, %v1577_v14  ;;  %v1190_v33 = vld [vmem:[%s1907_s8 + $0x30] sm:$0xff] }
  0xb5   :  { %v327_v60 = vsub.f32 2.0, %v319_v41  ;;  %594 = vmatpush.bf16.msra.mxu2 %v1190_v33  ;;  %v1198_v41 = vld [vmem:[%s1907_s8 + $0x70] sm:$0xff] }
  0xb6   :  { %v417_v6 = vsub.f32 1.0, %v409_v28  ;;  %v410_v45 = vmul.f32 %v1264_v9, %v402_v54  ;;  %v440_v9 = vsel %vm363_vm4, %v433_v19, %v439_v59  ;;  %v364_v32 = vsel %vm363_vm4, %v352_v20, %v362_v56  ;;  %533 = vmatpush.bf16.msra.mxu1 %v1198_v41  ;;  %v1186_v33 = vld [vmem:[%s1907_s8 + $0x10] sm:$0xff] }
  0xb7   :  { %v1268_v62 = vpop.eup %1267  ;;  %v335_v55 = vmul.f32 %v1266_v35, %v327_v60  ;;  %v1647_v54 = vmul.f32 %v1624_v36, %v145_v11  ;;  %v114_v60 = vpop.f32.mrf.mxu0 }
  0xb8   :  { %v320_v49 = vmul.f32 %v1268_v62, %v304_v26  ;;  %v418_v53 = vsub.f32 1.0, %v410_v45  ;;  %v434_v25 = vperm.slane %v417_v6, %v1580_v40  ;;  %vm126_vm10 = vcmp.gt.f32.partialorder %v114_v60, 0.5 }
  0xb9   :  { %v353_v26 = vperm.slane %v335_v55, %v1577_v14  ;;  %595 = vmatpush.bf16.msra.mxu2 %v1189_v47  ;;  %v741_v42 = vsub.f32 1.0, %v1647_v54  ;;  %v1712_v55 = vmul.f32 %v1624_v36, %v1514_v48 }
  0xba   :  { %v328_v27 = vsub.f32 2.0, %v320_v49  ;;  %v435_v31 = vperm.slane %v418_v53, %v1580_v40  ;;  %v441_v52 = vsel %vm365_vm5, %v434_v25, %v440_v9  ;;  %v1617_v40 = vld [vmem:[%s1906_s7 + $0x4] sm:$0xf]  ;;  %v1187_v53 = vld [vmem:[%s1907_s8 + $0x18] sm:$0xff] }
  0xbb   :  { %v366_v61 = vsel %vm365_vm5, %v353_v26, %v364_v32  ;;  %v1638_v1 = vmul.f32 %v1617_v40, %v185_v2  ;;  %v1642_v28 = vmul.f32 %v1617_v40, %v1477_v12  ;;  %v1654_v0 = vmul.f32 %v1617_v40, %v1482_v15  ;;  %v1196_v25 = vld [vmem:[%s1907_s8 + $0x60] sm:$0xff] }
  0xbc   :  { %v336_v30 = vmul.f32 %v1268_v62, %v328_v27  ;;  %v442_v35 = vsel %vm367_vm6, %v435_v31, %v441_v52  ;;  %v1658_v2 = vmul.f32 %v1617_v40, %v1474_v10  ;;  %v1662_v4 = vmul.f32 %v1617_v40, %v1479_v13  ;;  %v1188_v10 = vld [vmem:[%s1907_s8 + $0x20] sm:$0xff]  ;;  %v1197_v62 = vld [vmem:[%s1907_s8 + $0x68] sm:$0xff] }
  0xbd   :  { %v1666_v11 = vmul.f32 %v1617_v40, %v1526_v8  ;;  %v1670_v12 = vmul.f32 %v1617_v40, %v1516_v50  ;;  %v1674_v15 = vmul.f32 %v1624_v36, %v1496_v23  ;;  %v789_v17 = vsub.f32 1.0, %v1638_v1  ;;  %v1690_v23 = vld [vmem:[%s1906_s7] sm:$0xf]  ;;  %596 = vmatpush.bf16.msra.mxu2 %v1188_v10  ;;  %534 = vmatpush.bf16.msra.mxu1 %v1197_v62  ;;  %s1051_s7 = sshll.u32 %s1909_s10, 4  ;;  %s1052_s7 = int_to_ptr.hbm [resolvable:$true] %s1051_s7 }
  0xbe   :  { %v354_v58 = vperm.slane %v336_v30, %v1577_v14  ;;  %v790_v13 = vsub.f32 1.0, %v1642_v28  ;;  %v792_v8 = vsub.f32 1.0, %v1654_v0  ;;  %v1685_v50 = vmul.f32 %v1624_v36, %v1494_v22  ;;  %v1203_v22 = vld [vmem:[%s1904_s5] ss:$0 sm:$0xff]  ;;  %v1194_v0 = vld [vmem:[%s1907_s8 + $0x50] sm:$0xff] }
  0xbf   :  { %v791_v46 = vsub.f32 1.0, %v1658_v2  ;;  %v793_v57 = vsub.f32 1.0, %v1662_v4  ;;  %v795_v39 = vsub.f32 1.0, %v1666_v11  ;;  %v794_v6 = vsub.f32 1.0, %v1670_v12  ;;  %v1193_v11 = vld [vmem:[%s1907_s8 + $0x48] sm:$0xff]  ;;  %v1192_v12 = vld [vmem:[%s1907_s8 + $0x40] sm:$0xff] }
  0xc0   :  { %v368_v63 = vsel %vm367_vm6, %v354_v58, %v366_v61  ;;  %v743_v3 = vsub.f32 1.0, %v1674_v15  ;;  %v742_v29 = vsub.f32 1.0, %v1685_v50  ;;  %v122_v20 = vsub.f32 %v1203_v22, %v114_v60 }
  0xc1   :  { %370 = vst.msk [vmem:[#allocation2] sm:$0xff] %vm129_vm7, %v368_v63  ;;  %597 = vmatpush.bf16.msra.mxu2 %v1187_v53  ;;  %v1109_v31 = vsel %vm126_vm10, 1.0, %v1385_v34  ;;  %535 = vmatpush.bf16.msra.mxu1 %v1196_v25  ;;  %v1195_v53 = vld [vmem:[%s1907_s8 + $0x58] sm:$0xff]  ;;  %v1185_v25 = vld [vmem:[%s1907_s8 + $0x8] sm:$0xff] }
  0xc2   :  { %444 = vst.msk [vmem:[#allocation2] sm:$0xff] %vm131_vm8, %v442_v35  ;;  %vm123_vm11 = vcmp.lt.f32.partialorder %v122_v20, 0.5 }
  0xc3   :  { %446 = vst.msk [vmem:[#allocation2] sm:$0xff] %vm445_vm9, %v1385_v34  ;;  %v1108_v38 = vsel %vm123_vm11, 1.0, %v1385_v34 }
  0xc4   :  { %130 = vst.msk [vmem:[#allocation3] sm:$0xff] %vm129_vm7, %v1108_v38  ;;  %vm619_vm7 = vcmask 64544  }
  0xc5   :  { %598 = vmatpush.bf16.msra.mxu2 %v1186_v33  ;;  %132 = vst.msk [vmem:[#allocation3] sm:$0xff] %vm131_vm8, %v1109_v31  ;;  %536 = vmatpush.bf16.msra.mxu1 %v1195_v53  ;;  %vm1041_vm8 = vcmask 1047616  }
  0xc6   :  { %447 = vst.msk [vmem:[#allocation3] sm:$0xff] %vm445_vm9, %v1385_v34 }
  0xc9   :  { %599 = vmatpush.bf16.msra.mxu2 %v1185_v25  ;;  %537 = vmatpush.bf16.msra.mxu1 %v1194_v0 }
  0xca   :  { %v1696_v45 = vld [vmem:[#allocation2] sm:$0xff] }
  0xcb   :  { %v673_v49 = vperm.slane %v1696_v45, 0  ;;  %v666_v7 = vrot.slane %v1696_v45, 1  ;;  %v1717_v16 = vsub.f32 1.0, %v1696_v45  ;;  %v668_v19 = vrot.slane %v1696_v45, 3 }
  0xcc   :  { %v667_v48 = vrot.slane %v1696_v45, 2  ;;  %v669_v51 = vrot.slane %v1696_v45, 4  ;;  %v671_v47 = vrot.slane %v1696_v45, 6 }
  0xcd   :  { %v689_v27 = vmul.f32 %v673_v49, %v1690_v23  ;;  %v674_v56 = vperm.slane %v666_v7, 0  ;;  %v633_v26 = vperm.slane %v1717_v16, 0  ;;  %v676_v59 = vperm.slane %v668_v19, 0  ;;  %v116_v19 = vpop.f32.mrf.mxu0  ;;  %538 = vmatpush.bf16.msra.mxu1 %v1193_v11 }
  0xce   :  { %v675_v30 = vperm.slane %v667_v48, 0  ;;  %v677_v9 = vperm.slane %v669_v51, 0  ;;  %v679_v49 = vperm.slane %v671_v47, 0  ;;  %v670_v7 = vrot.slane %v1696_v45, 5  ;;  %v448_v19 = vld [vmem:[#allocation3] sm:$0xff] }
  0xcf   :  { %v697_v32 = vsub.f32 1.0, %v689_v27  ;;  %v690_v52 = vmul.f32 %v674_v56, %v1690_v23  ;;  %v649_v58 = vmul.f32 %v633_v26, %v1726_v43  ;;  %v692_v61 = vmul.f32 %v676_v59, %v1690_v23 }
  0xd0   :  { %v691_v63 = vmul.f32 %v675_v30, %v1690_v23  ;;  %v693_v35 = vmul.f32 %v677_v9, %v1690_v23  ;;  %v678_v54 = vperm.slane %v670_v7, 0  ;;  %v627_v4 = vrot.slane %v1717_v16, 2  ;;  %v1184_v30 = vld [vmem:[%s1907_s8] sm:$0xff] }
  0xd1   :  { %v797_v1 = vmul.f32 %v789_v17, %v697_v32  ;;  %v698_v41 = vsub.f32 1.0, %v690_v52  ;;  %v657_v10 = vsub.f32 1.0, %v649_v58  ;;  %v700_v60 = vsub.f32 1.0, %v692_v61  ;;  %600 = vmatpush.bf16.msra.mxu2 %v1184_v30  ;;  %539 = vmatpush.bf16.msra.mxu1 %v1192_v12 }
  0xd2   :  { %v699_v22 = vsub.f32 1.0, %v691_v63  ;;  %v701_v62 = vsub.f32 1.0, %v693_v35  ;;  %v628_v9 = vrot.slane %v1717_v16, 3  ;;  %v744_v52 = vsub.f32 1.0, %v1708_v5 }
  0xd3   :  { %v813_v48 = vmax.f32 %v797_v1, 1e-37  ;;  %v798_v17 = vmul.f32 %v790_v13, %v698_v41  ;;  %v749_v51 = vmul.f32 %v741_v42, %v657_v10  ;;  %v800_v20 = vmul.f32 %v792_v8, %v700_v60 }
  0xd4   :  { %v799_v27 = vmul.f32 %v791_v46, %v699_v22  ;;  %v801_v28 = vmul.f32 %v793_v57, %v701_v62  ;;  %v695_v13 = vmul.f32 %v679_v49, %v1690_v23  ;;  %v694_v46 = vmul.f32 %v678_v54, %v1690_v23  ;;  %540 = vmatmul.bf16.vlgmr.msra.gmra.mxu1 %v1571_v24 }
  0xd5   :  { %1269 = vlog2.f32 %v813_v48  ;;  %v814_v42 = vmax.f32 %v798_v17, 1e-37  ;;  %v805_v8 = vmax.f32 %v749_v51, 1e-37  ;;  %v816_v56 = vmax.f32 %v800_v20, 1e-37 }
  0xd6   :  { %v815_v26 = vmax.f32 %v799_v27, 1e-37  ;;  %v817_v59 = vmax.f32 %v801_v28, 1e-37  ;;  %v703_v2 = vsub.f32 1.0, %v695_v13  ;;  %v626_v57 = vrot.slane %v1717_v16, 1 }
  0xd7   :  { %1271 = vlog2.f32 %v814_v42  ;;  %v702_v32 = vsub.f32 1.0, %v694_v46  ;;  %v635_v58 = vperm.slane %v627_v4, 0  ;;  %v636_v33 = vperm.slane %v628_v9, 0 }
  0xd8   :  { %1273 = vlog2.f32 %v805_v8  ;;  %v803_v31 = vmul.f32 %v795_v39, %v703_v2  ;;  %v634_v61 = vperm.slane %v626_v57, 0  ;;  %v630_v38 = vrot.slane %v1717_v16, 5 }
  0xd9   :  { %1275 = vlog2.f32 %v816_v56  ;;  %v802_v35 = vmul.f32 %v794_v6, %v702_v32  ;;  %v651_v5 = vmul.f32 %v635_v58, %v1726_v43  ;;  %v652_v1 = vmul.f32 %v636_v33, %v1726_v43 }
  0xda   :  { %1277 = vlog2.f32 %v815_v26  ;;  %v819_v63 = vmax.f32 %v803_v31, 1e-37  ;;  %v650_v47 = vmul.f32 %v634_v61, %v1726_v43  ;;  %v638_v60 = vperm.slane %v630_v38, 0 }
  0xdb   :  { %v1270_v39 = vpop.eup %1269  ;;  %1279 = vlog2.f32 %v817_v59  ;;  %v818_v10 = vmax.f32 %v802_v35, 1e-37  ;;  %v659_v22 = vsub.f32 1.0, %v651_v5  ;;  %v660_v49 = vsub.f32 1.0, %v652_v1 }
  0xdc   :  { %v863_v41 = vmul.f32 0.6931472, %v1270_v39  ;;  %1281 = vlog2.f32 %v819_v63  ;;  %v658_v62 = vsub.f32 1.0, %v650_v47  ;;  %v746_v7 = vsub.f32 1.0, %v1712_v55 }
  0xdd   :  { %v1272_v6 = vpop.eup %1271  ;;  %1283 = vlog2.f32 %v818_v10  ;;  %v654_v51 = vmul.f32 %v638_v60, %v1726_v43  ;;  %v751_v27 = vmul.f32 %v743_v3, %v659_v22  ;;  %v752_v13 = vmul.f32 %v744_v52, %v660_v49 }
  0xde   :  { %v1274_v53 = vpop.eup %1273  ;;  %v878_v48 = vsel %vm837_vm12, %v863_v41, 0.0  ;;  %v865_v17 = vmul.f32 0.6931472, %v1272_v6  ;;  %v750_v28 = vmul.f32 %v742_v29, %v658_v62  ;;  %v449_v8 = vpack.c.bf16 %v448_v19, %v448_v19 }
  0xdf   :  { %v1276_v20 = vpop.eup %1275  ;;  %879 = vadd.xlane.f32.xlu1 %v878_v48  ;;  %v822_v25 = vmul.f32 0.6931472, %v1274_v53  ;;  %v662_v42 = vsub.f32 1.0, %v654_v51  ;;  %v807_v2 = vmax.f32 %v751_v27, 1e-37  ;;  %v629_v15 = vrot.slane %v1717_v16, 4 }
  0xe0   :  { %v1278_v54 = vpop.eup %1277  ;;  %v881_v55 = vsel %vm837_vm12, %v865_v17, 0.0  ;;  %v869_v0 = vmul.f32 0.6931472, %v1276_v20  ;;  %601 = vmatmul.bf16.vlgmr.msra.gmra.mxu2 %v449_v8  ;;  %v806_v46 = vmax.f32 %v750_v28, 1e-37  ;;  %v737_v58 = vmul.f32 %v1624_v36, %v1510_v44 }
  0xe1   :  { %v1280_v56 = vpop.eup %1279  ;;  %882 = vadd.xlane.f32.xlu2 %v881_v55  ;;  %v838_v26 = vsel %vm837_vm12, %v822_v25, 0.0  ;;  %v867_v59 = vmul.f32 0.6931472, %v1278_v54  ;;  %v754_v29 = vmul.f32 %v746_v7, %v662_v42  ;;  %1285 = vlog2.f32 %v807_v2 }
  0xe2   :  { %v1282_v3 = vpop.eup %1281  ;;  %839 = vadd.xlane.f32.xlu0 %v838_v26  ;;  %v871_v50 = vmul.f32 0.6931472, %v1280_v56  ;;  %v887_v57 = vsel %vm837_vm12, %v869_v0, 0.0  ;;  %v808_v30 = vmax.f32 %v752_v13, 1e-37  ;;  %v637_v9 = vperm.slane %v629_v15, 0 }
  0xe3   :  { %v1284_v4 = vpop.eup %1283  ;;  %v884_v31 = vsel %vm837_vm12, %v867_v59, 0.0  ;;  %v875_v32 = vmul.f32 0.6931472, %v1282_v3  ;;  %v810_v52 = vmax.f32 %v754_v29, 1e-37  ;;  %v631_v63 = vrot.slane %v1717_v16, 6 }
  0xe4   :  { %v890_v61 = vsel %vm837_vm12, %v871_v50, 0.0  ;;  %v653_v33 = vmul.f32 %v637_v9, %v1726_v43  ;;  %v739_v24 = vmul.f32 %v1624_v36, %v1531_v21  ;;  %1287 = vlog2.f32 %v806_v46 }
  0xe5   :  { %v745_v35 = vsub.f32 1.0, %v737_v58  ;;  %v672_v38 = vrot.slane %v1696_v45, 7  ;;  %v788_v11 = vmul.f32 %v1617_v40, %v1529_v18  ;;  %1289 = vlog2.f32 %v808_v30 }
  0xe6   :  { %v661_v39 = vsub.f32 1.0, %v653_v33  ;;  %v639_v44 = vperm.slane %v631_v63, 0  ;;  %v632_v5 = vrot.slane %v1717_v16, 7  ;;  %v873_v1 = vmul.f32 0.6931472, %v1284_v4 }
  0xe7   :  { %888 = vadd.xlane.f32.xlu1 %v887_v57  ;;  %v1286_v47 = vpop.eup %1285  ;;  %1291 = vlog2.f32 %v810_v52  ;;  %v680_v41 = vperm.slane %v672_v38, 0  ;;  %v740_v21 = vmul.f32 %v1624_v36, %v1546_v37  ;;  %v747_v60 = vsub.f32 1.0, %v739_v24 }
  0xe8   :  { %v753_v10 = vmul.f32 %v745_v35, %v661_v39  ;;  %v655_v45 = vmul.f32 %v639_v44, %v1726_v43  ;;  %v640_v12 = vperm.slane %v632_v5, 0  ;;  %v826_v18 = vmul.f32 0.6931472, %v1286_v47 }
  0xe9   :  { %885 = vadd.xlane.f32.xlu2 %v884_v31  ;;  %v696_v40 = vmul.f32 %v680_v41, %v1690_v23  ;;  %v796_v6 = vsub.f32 1.0, %v788_v11  ;;  %v896_v16 = vsel %vm837_vm12, %v875_v32, 0.0  ;;  %v748_v53 = vsub.f32 1.0, %v740_v21 }
  0xea   :  { %891 = vadd.xlane.f32.xlu0 %v890_v61  ;;  %v809_v22 = vmax.f32 %v753_v10, 1e-37  ;;  %v663_v62 = vsub.f32 1.0, %v655_v45  ;;  %v1288_v49 = vpop.eup %1287  ;;  %v656_v19 = vmul.f32 %v640_v12, %v1726_v43  ;;  %v893_v36 = vsel %vm837_vm12, %v873_v1, 0.0 }
  0xeb   :  { %v704_v7 = vsub.f32 1.0, %v696_v40  ;;  %v1290_v37 = vpop.eup %1289  ;;  %v844_v51 = vsel %vm837_vm12, %v826_v18, 0.0  ;;  %v824_v25 = vmul.f32 0.6931472, %v1288_v49 }
  0xec   :  { %v755_v48 = vmul.f32 %v747_v60, %v663_v62  ;;  %1293 = vlog2.f32 %v809_v22  ;;  %v664_v20 = vsub.f32 1.0, %v656_v19  ;;  %v828_v54 = vmul.f32 0.6931472, %v1290_v37  ;;  %v1204_v60 = vld [vmem:[%s1908_s9] ss:$0 sm:$0xff]  ;;  %s1847_s9 = sshll.u32 %s1386_s30, 4  ;;  %s1061_s9 = int_to_ptr.vmem [resolvable:$true] %s1847_s9 }
  0xed   :  { %v1292_v17 = vpop.eup %1291  ;;  %v804_v23 = vmul.f32 %v796_v6, %v704_v7  ;;  %v841_v0 = vsel %vm837_vm12, %v824_v25, 0.0 }
  0xee   :  { %v811_v27 = vmax.f32 %v755_v48, 1e-37  ;;  %v756_v13 = vmul.f32 %v748_v53, %v664_v20  ;;  %v832_v43 = vmul.f32 0.6931472, %v1292_v17  ;;  %v847_v8 = vsel %vm837_vm12, %v828_v54, 0.0 }
  0xef   :  { %897 = vadd.xlane.f32.xlu1 %v896_v16  ;;  %v820_v28 = vmax.f32 %v804_v23, 1e-37 }
  0xf0   :  { %1295 = vlog2.f32 %v811_v27  ;;  %v812_v55 = vmax.f32 %v756_v13, 1e-37  ;;  %v853_v56 = vsel %vm837_vm12, %v832_v43, 0.0 }
  0xf1   :  { %894 = vadd.xlane.f32.xlu2 %v893_v36  ;;  %1297 = vlog2.f32 %v820_v28 }
  0xf2   :  { %845 = vadd.xlane.f32.xlu0 %v844_v51  ;;  %v1294_v42 = vpop.eup %1293  ;;  %1299 = vlog2.f32 %v812_v55 }
  0xf3   :  { %v830_v59 = vmul.f32 0.6931472, %v1294_v42 }
  0xf5   :  { %v850_v50 = vsel %vm837_vm12, %v830_v59, 0.0 }
  0xf6   :  { %v1296_v26 = vpop.eup %1295 }
  0xf7   :  { %842 = vadd.xlane.f32.xlu1 %v841_v0  ;;  %v1298_v2 = vpop.eup %1297  ;;  %v834_v15 = vmul.f32 0.6931472, %v1296_v26 }
  0xf8   :  { %v877_v3 = vmul.f32 0.6931472, %v1298_v2  ;;  %v1300_v29 = vpop.eup %1299 }
  0xf9   :  { %848 = vadd.xlane.f32.xlu2 %v847_v8  ;;  %v856_v46 = vsel %vm837_vm12, %v834_v15, 0.0  ;;  %v836_v57 = vmul.f32 0.6931472, %v1300_v29 }
  0xfa   :  { %854 = vadd.xlane.f32.xlu0 %v853_v56  ;;  %v899_v4 = vsel %vm837_vm12, %v877_v3, 0.0 }
  0xfb   :  { %v859_v30 = vsel %vm837_vm12, %v836_v57, 0.0 }
  0xff   :  { %851 = vadd.xlane.f32.xlu1 %v850_v50  ;;  %v1860_v50 = vadd.s32 4294967292, %v1577_v14 }
 0x101   :  { %857 = vadd.xlane.f32.xlu2 %v856_v46 }
 0x102   :  { %900 = vadd.xlane.f32.xlu0 %v899_v4 }
 0x107   :  { %860 = vadd.xlane.f32.xlu1 %v859_v30 }
 0x151   :  { %v541_v38 = vpop.f32.mrf.mxu1 }
 0x152   :  { %v880_v9 = vpop.xlane.xlu1 %879 }
 0x153   :  { %v967_v58 = vsub.f32 1.0, %v880_v9 }
 0x154   :  { %v883_v31 = vpop.xlane.xlu2 %882 }
 0x155   :  { %v840_v32 = vpop.xlane.xlu0 %839  ;;  %v968_v33 = vsub.f32 1.0, %v883_v31  ;;  %1301 = vrcp.f32 %v967_v58 }
 0x156   :  { %v902_v35 = vsub.f32 1.0, %v840_v32 }
 0x157   :  { %1303 = vrcp.f32 %v968_v33 }
 0x159   :  { %v543_v6 = vpop.f32.mrf.mxu1 }
 0x15a   :  { %v1832_v52 = vpop.xlane.xlu1 %888 }
 0x15b   :  { %v1302_v44 = vpop.eup %1301  ;;  %v970_v5 = vsub.f32 1.0, %v1832_v52 }
 0x15c   :  { %v886_v61 = vpop.xlane.xlu2 %885  ;;  %v983_v12 = vmul.f32 %v1302_v44, %v967_v58 }
 0x15d   :  { %v1834_v63 = vpop.xlane.xlu0 %891  ;;  %v969_v24 = vsub.f32 1.0, %v886_v61  ;;  %v1304_v21 = vpop.eup %1303 }
 0x15e   :  { %v971_v10 = vsub.f32 1.0, %v1834_v63  ;;  %v984_v22 = vmul.f32 %v1304_v21, %v968_v33  ;;  %v991_v53 = vsub.f32 2.0, %v983_v12 }
 0x15f   :  { %1305 = vrcp.f32 %v969_v24 }
 0x160   :  { %1307 = vrcp.f32 %v902_v35  ;;  %v992_v13 = vsub.f32 2.0, %v984_v22  ;;  %v999_v43 = vmul.f32 %v1302_v44, %v991_v53 }
 0x161   :  { %1309 = vrcp.f32 %v970_v5 }
 0x162   :  { %v1836_v11 = vpop.xlane.xlu1 %897  ;;  %v1000_v59 = vmul.f32 %v1304_v21, %v992_v13  ;;  %v1007_v29 = vsub.f32 1.0, %v999_v43 }
 0x163   :  { %v602_v1 = vpop.f32.mrf.mxu2  ;;  %v973_v37 = vsub.f32 1.0, %v1836_v11 }
 0x164   :  { %v1838_v39 = vpop.xlane.xlu2 %894  ;;  %v603_v45 = vadd.f32 %v602_v1, %v541_v38  ;;  %v1008_v38 = vsub.f32 1.0, %v1000_v59 }
 0x165   :  { %v846_v47 = vpop.xlane.xlu0 %845  ;;  %v972_v18 = vsub.f32 1.0, %v1838_v39  ;;  %v1306_v16 = vpop.eup %1305 }
 0x166   :  { %v904_v41 = vsub.f32 1.0, %v846_v47  ;;  %v610_v40 = vsub.f32 %v1204_v60, %v603_v45  ;;  %vm614_vm13 = vcmp.gt.f32.partialorder %v603_v45, 0.5  ;;  %v1308_v49 = vpop.eup %1307  ;;  %v985_v17 = vmul.f32 %v1306_v16, %v969_v24 }
 0x167   :  { %v1175_v19 = vsel %vm614_vm13, 1.0, %v1385_v34  ;;  %v918_v25 = vmul.f32 %v1308_v49, %v902_v35  ;;  %v1310_v28 = vpop.eup %1309 }
 0x168   :  { %1311 = vrcp.f32 %v904_v41  ;;  %vm611_vm15 = vcmp.lt.f32.partialorder %v610_v40, 0.5  ;;  %v993_v0 = vsub.f32 2.0, %v985_v17  ;;  %v986_v2 = vmul.f32 %v1310_v28, %v970_v5 }
 0x169   :  { %1313 = vrcp.f32 %v971_v10  ;;  %v1174_v48 = vsel %vm611_vm15, 1.0, %v1385_v34  ;;  %v926_v8 = vsub.f32 2.0, %v918_v25 }
 0x16a   :  { %v843_v62 = vpop.xlane.xlu1 %842  ;;  %1315 = vrcp.f32 %v972_v18  ;;  %618 = vst.msk [vmem:[#allocation6] sm:$0xff] %vm617_vm14, %v1174_v48  ;;  %v1001_v9 = vmul.f32 %v1306_v16, %v993_v0  ;;  %v994_v11 = vsub.f32 2.0, %v986_v2 }
 0x16b   :  { %v903_v7 = vsub.f32 1.0, %v843_v62  ;;  %v604_v20 = vpop.f32.mrf.mxu2  ;;  %620 = vst.msk [vmem:[#allocation6] sm:$0xff] %vm619_vm7, %v1175_v19  ;;  %v934_v61 = vmul.f32 %v1308_v49, %v926_v8  ;;  %v1025_v62 = vperm.slane %v1008_v38, %v1860_v50 }
 0x16c   :  { %v849_v36 = vpop.xlane.xlu2 %848  ;;  %1043 = vst.msk [vmem:[#allocation6] sm:$0xff] %vm1041_vm8, %v1385_v34  ;;  %v1009_v1 = vsub.f32 1.0, %v1001_v9  ;;  %v1002_v6 = vmul.f32 %v1310_v28, %v994_v11 }
 0x16d   :  { %1317 = vrcp.f32 %v903_v7  ;;  %v905_v51 = vsub.f32 1.0, %v849_v36  ;;  %v855_v23 = vpop.xlane.xlu0 %854  ;;  %1065 = dma.vmem_to_hbm [thread:$0]  %s1061_s9, 128, %s1063_s14, [#allocation7]   ;;  %v950_v40 = vperm.slane %v934_v61, %v1577_v14 }
 0x16e   :  { %v907_v27 = vsub.f32 1.0, %v855_v23  ;;  %v1312_v54 = vpop.eup %1311 }
 0x16f   :  { %1319 = vrcp.f32 %v905_v51  ;;  %v1314_v55 = vpop.eup %1313  ;;  %v920_v15 = vmul.f32 %v1312_v54, %v904_v41 }
 0x170   :  { %1321 = vrcp.f32 %v973_v37  ;;  %v1316_v42 = vpop.eup %1315  ;;  %v987_v46 = vmul.f32 %v1314_v55, %v971_v10  ;;  %v1024_v10 = vperm.slane %v1007_v29, %v1860_v50 }
 0x171   :  { %1323 = vrcp.f32 %v907_v27  ;;  %v988_v31 = vmul.f32 %v1316_v42, %v972_v18  ;;  %v928_v39 = vsub.f32 2.0, %v920_v15 }
 0x172   :  { %v852_v56 = vpop.xlane.xlu1 %851  ;;  %v995_v44 = vsub.f32 2.0, %v987_v46 }
 0x173   :  { %v1318_v26 = vpop.eup %1317  ;;  %v906_v3 = vsub.f32 1.0, %v852_v56  ;;  %v996_v21 = vsub.f32 2.0, %v988_v31  ;;  %v936_v16 = vmul.f32 %v1312_v54, %v928_v39  ;;  %v1032_v54 = vsel %vm355_vm0, %v1025_v62, %v1024_v10 }
 0x174   :  { %v919_v4 = vmul.f32 %v1318_v26, %v903_v7  ;;  %v858_v57 = vpop.xlane.xlu2 %857  ;;  %v1003_v49 = vmul.f32 %v1314_v55, %v995_v44 }
 0x175   :  { %v1320_v30 = vpop.eup %1319  ;;  %1325 = vrcp.f32 %v906_v3  ;;  %v908_v32 = vsub.f32 1.0, %v858_v57  ;;  %v901_v52 = vpop.xlane.xlu0 %900  ;;  %v1004_v48 = vmul.f32 %v1316_v42, %v996_v21  ;;  %v952_v28 = vperm.slane %v936_v16, %v1577_v14 }
 0x176   :  { %v1322_v58 = vpop.eup %1321  ;;  %v927_v33 = vsub.f32 2.0, %v919_v4  ;;  %v921_v63 = vmul.f32 %v1320_v30, %v905_v51  ;;  %v974_v24 = vsub.f32 1.0, %v901_v52  ;;  %v1011_v8 = vsub.f32 1.0, %v1003_v49 }
 0x177   :  { %v1324_v35 = vpop.eup %1323  ;;  %1327 = vrcp.f32 %v908_v32  ;;  %v989_v41 = vmul.f32 %v1322_v58, %v973_v37  ;;  %v1026_v37 = vperm.slane %v1009_v1, %v1860_v50  ;;  %v1012_v56 = vsub.f32 1.0, %v1004_v48 }
 0x178   :  { %v935_v5 = vmul.f32 %v1318_v26, %v927_v33  ;;  %v929_v47 = vsub.f32 2.0, %v921_v63  ;;  %1329 = vrcp.f32 %v974_v24  ;;  %v923_v60 = vmul.f32 %v1324_v35, %v907_v27 }
 0x179   :  { %v997_v36 = vsub.f32 2.0, %v989_v41  ;;  %v1010_v27 = vsub.f32 1.0, %v1002_v6  ;;  %v1033_v59 = vsel %vm357_vm1, %v1026_v37, %v1032_v54 }
 0x17a   :  { %v951_v45 = vperm.slane %v935_v5, %v1577_v14  ;;  %v861_v12 = vpop.xlane.xlu1 %860  ;;  %v937_v7 = vmul.f32 %v1320_v30, %v929_v47  ;;  %v931_v23 = vsub.f32 2.0, %v923_v60 }
 0x17b   :  { %v1326_v18 = vpop.eup %1325  ;;  %v909_v22 = vsub.f32 1.0, %v861_v12  ;;  %v1005_v2 = vmul.f32 %v1322_v58, %v997_v36  ;;  %v1027_v46 = vperm.slane %v1010_v27, %v1860_v50  ;;  %v1028_v58 = vperm.slane %v1011_v8, %v1860_v50 }
 0x17c   :  { %v922_v19 = vmul.f32 %v1326_v18, %v906_v3  ;;  %v958_v51 = vsel %vm355_vm0, %v951_v45, %v950_v40  ;;  %v953_v43 = vperm.slane %v937_v7, %v1577_v14  ;;  %v939_v15 = vmul.f32 %v1324_v35, %v931_v23 }
 0x17d   :  { %v1328_v53 = vpop.eup %1327  ;;  %1331 = vrcp.f32 %v909_v22  ;;  %v959_v42 = vsel %vm357_vm1, %v952_v28, %v958_v51  ;;  %v1034_v31 = vsel %vm359_vm2, %v1027_v46, %v1033_v59  ;;  %v1013_v33 = vsub.f32 1.0, %v1005_v2 }
 0x17e   :  { %v1330_v17 = vpop.eup %1329  ;;  %v930_v20 = vsub.f32 2.0, %v922_v19  ;;  %v924_v25 = vmul.f32 %v1328_v53, %v908_v32  ;;  %v960_v30 = vsel %vm359_vm2, %v953_v43, %v959_v42  ;;  %v1029_v32 = vperm.slane %v1012_v56, %v1860_v50 }
 0x17f   :  { %v990_v13 = vmul.f32 %v1330_v17, %v974_v24  ;;  %v955_v63 = vperm.slane %v939_v15, %v1577_v14  ;;  %v1035_v38 = vsel %vm361_vm3, %v1028_v58, %v1034_v31  ;;  %v1030_v47 = vperm.slane %v1013_v33, %v1860_v50 }
 0x180   :  { %v938_v55 = vmul.f32 %v1326_v18, %v930_v20  ;;  %v932_v0 = vsub.f32 2.0, %v924_v25  ;;  %v1036_v5 = vsel %vm363_vm4, %v1029_v32, %v1035_v38 }
 0x181   :  { %v998_v26 = vsub.f32 2.0, %v990_v13  ;;  %v1037_v10 = vsel %vm365_vm5, %v1030_v47, %v1036_v5 }
 0x182   :  { %v954_v3 = vperm.slane %v938_v55, %v1577_v14  ;;  %v940_v4 = vmul.f32 %v1328_v53, %v932_v0 }
 0x183   :  { %v1332_v29 = vpop.eup %1331  ;;  %v1006_v57 = vmul.f32 %v1330_v17, %v998_v26 }
 0x184   :  { %v925_v9 = vmul.f32 %v1332_v29, %v909_v22  ;;  %v961_v52 = vsel %vm361_vm3, %v954_v3, %v960_v30  ;;  %v956_v35 = vperm.slane %v940_v4, %v1577_v14 }
 0x185   :  { %v1014_v61 = vsub.f32 1.0, %v1006_v57  ;;  %v962_v39 = vsel %vm363_vm4, %v955_v63, %v961_v52 }
 0x186   :  { %v933_v24 = vsub.f32 2.0, %v925_v9  ;;  %v963_v41 = vsel %vm365_vm5, %v956_v35, %v962_v39 }
 0x187   :  { %v1031_v44 = vperm.slane %v1014_v61, %v1860_v50 }
 0x188   :  { %v941_v11 = vmul.f32 %v1332_v29, %v933_v24 }
 0x189   :  { %v1038_v45 = vsel %vm367_vm6, %v1031_v44, %v1037_v10 }
 0x18a   :  { %v957_v1 = vperm.slane %v941_v11, %v1577_v14 }
 0x18c   :  { %v964_v21 = vsel %vm367_vm6, %v957_v1, %v963_v41 }
 0x18d   :  { %966 = vst.msk [vmem:[#allocation4] sm:$0xff] %vm617_vm14, %v964_v21 }
 0x18e   :  { %1040 = vst.msk [vmem:[#allocation4] sm:$0xff] %vm619_vm7, %v1038_v45 }
 0x18f   :  { %1042 = vst.msk [vmem:[#allocation4] sm:$0xff] %vm1041_vm8, %v1385_v34 }
 0x190   :  { %1054 = dma.vmem_to_hbm [thread:$0]  %s1050_s15, 128, %s1052_s7, [#allocation5]  }
 0x191   :  { %1381 = dma.done.wait [#allocation5], 128  }
 0x192   :  { %1382 = vsyncadd [#allocation5], 4294967168 }
 0x193   :  { %1383 = dma.done.wait [#allocation7], 128  }
 0x194   :  { %1384 = vsyncadd [#allocation7], 4294967168 }
 0x195   :  { %1074 = vsyncpa [#allocation5], 1 }
 0x196   :  { %1075 = vsyncpa [#allocation7], 1 }

</bundles_post_ra>
